<compile_context>
chip_gen: v5e
topology: v5e:2x2
jax: 0.10.0
libtpu: 0.0.40
codegen_flags: <defaults>
</compile_context>

<pallas_src>
import functools

import jax
import jax.numpy as jnp
from jax.experimental import pallas as pl
from jax.experimental.pallas import tpu as pltpu

EPS = 1e-5
H = 128        # lane-dense padded hidden width (real hidden = 10, real out = 2)
N_HID = 10
N_OUT = 2
F_IN = 157
N_VEC = 10     # packed bias / gamma / beta rows


def _fast_sigmoid(v):
    # sigmoid(x) == 0.5 * (tanh(x / 2) + 1): one EUP op instead of exp + divide.
    return 0.5 * (jnp.tanh(0.5 * v) + 1.0)


def deepnet_cross_kernel(x_ref, w1t_ref, wtail_ref, vecs_ref, o_ref,
                         h1_ref, sum_ref, ssq_ref, stage_ref, dma_sem,
                         *, n_tiles, tile_rows):
    i = pl.program_id(0)

    @pl.when(i == 0)
    def _init():
        sum_ref[...] = jnp.zeros_like(sum_ref)
        ssq_ref[...] = jnp.zeros_like(ssq_ref)

    # ---------- phase 1: stream this batch tile through fc1 (HBM bound) ----
    # (TB, 157) @ (157, 128): weights pre-transposed & zero-padded -> no .T,
    # lane-dense unmasked stores into the resident slab.
    a1 = jnp.dot(x_ref[...], w1t_ref[...],
                 preferred_element_type=jnp.float32) + vecs_ref[0:1, :]
    row0 = pl.multiple_of(i * tile_rows, tile_rows)
    h1_ref[pl.ds(row0, tile_rows), :] = a1
    sum_ref[...] += jnp.sum(a1, axis=0, keepdims=True)     # BN1 stats, 1 pass
    ssq_ref[...] += jnp.sum(a1 * a1, axis=0, keepdims=True)

    # ---------- phase 2: full-batch BN + tiny tail on the last tile --------
    @pl.when(i == n_tiles - 1)
    def _finalize():
        batch = h1_ref.shape[0]
        inv_b = jnp.float32(1.0 / batch)
        tail_dt = wtail_ref.dtype          # f32, or bf16 when tail_bf16=True

        def folded(mean, var, g, be):
            # Clamp: E[x^2] - E[x]^2 can go slightly negative -> NaN in rsqrt.
            scale = g * jax.lax.rsqrt(jnp.maximum(var, 0.0) + EPS)
            return scale, be - mean * scale

        def row_slice(c):
            return pl.ds(pl.multiple_of(c * tile_rows, tile_rows), tile_rows)

        # ---- BN1 (stats streamed in phase 1) + sigmoid, chunked, in place.
        mean1 = sum_ref[...] * inv_b
        var1 = ssq_ref[...] * inv_b - mean1 * mean1
        scale1, shift1 = folded(mean1, var1, vecs_ref[1:2, :], vecs_ref[2:3, :])

        @pl.loop(0, n_tiles)
        def _(c):
            rows = row_slice(c)
            h1_ref[rows, :] = _fast_sigmoid(h1_ref[rows, :] * scale1 + shift1)

        # ---- fc2 / fc3 + BN + sigmoid: chunked stats pass + in-place apply.
        def tail_bn_layer(layer, bias, g, be):
            w = wtail_ref[layer]
            sum_ref[...] = jnp.zeros_like(sum_ref)
            ssq_ref[...] = jnp.zeros_like(ssq_ref)

            @pl.loop(0, n_tiles)
            def _(c):
                rows = row_slice(c)
                a = jnp.dot(h1_ref[rows, :].astype(tail_dt), w,
                            preferred_element_type=jnp.float32) + bias
                sum_ref[...] += jnp.sum(a, axis=0, keepdims=True)
                ssq_ref[...] += jnp.sum(a * a, axis=0, keepdims=True)
                h1_ref[rows, :] = a            # overwrite the slab in place

            m = sum_ref[...] * inv_b
            v = ssq_ref[...] * inv_b - m * m
            scale, shift = folded(m, v, g, be)

            @pl.loop(0, n_tiles)
            def _(c):
                rows = row_slice(c)
                h1_ref[rows, :] = _fast_sigmoid(h1_ref[rows, :] * scale + shift)

        tail_bn_layer(0, vecs_ref[3:4, :], vecs_ref[4:5, :], vecs_ref[5:6, :])
        tail_bn_layer(1, vecs_ref[6:7, :], vecs_ref[7:8, :], vecs_ref[8:9, :])

        # ---- fc4 + sigmoid, chunked; stream (TB, 2) chunks to the HBM output
        # through a small staging buffer (no (B, 128)-sized resident output).
        w4 = wtail_ref[2]
        b4 = vecs_ref[9:10, :]

        @pl.loop(0, n_tiles)
        def _(c):
            rows = row_slice(c)
            a = jnp.dot(h1_ref[rows, :].astype(tail_dt), w4,
                        preferred_element_type=jnp.float32) + b4
            stage_ref[...] = _fast_sigmoid(a[:, :N_OUT])
            # TODO(synk): double-buffer stage/sem to hide the per-chunk DMA
            # issue+wait latency when the batch is very large.
            cp = pltpu.make_async_copy(stage_ref, o_ref.at[rows, :], dma_sem)
            cp.start()
            cp.wait()


@functools.partial(jax.jit, static_argnames=("tb", "tail_bf16"))
def deepnet_cross_forward(x, w1t, wtail, vecs, *, tb=2048, tail_bf16=False):
    """Fused DeepNetCross forward (training-mode BatchNorm1d).

    tb:        batch tile rows for the streamed fc1 phase / chunked finalize.
               1024-4096 keeps the HBM stream near roofline (v5e/v6e: 2048-4096,
               v7x: 1024-2048); falls back to one whole-batch tile otherwise.
    tail_bf16: run the padded 128x128 tail matmuls with bf16 operands (f32
               accumulation and f32 BN stats).  ~4-8x faster tail; ~1e-3 error.
    """
    B, F = x.shape
    assert F == F_IN
    TB = tb if (B >= tb and B % tb == 0) else B
    nt = B // TB

    # NOTE: casting x to bf16 here would be an HBM *regression* (a standalone
    # convert reads + writes x before the kernel reads it again); only stream
    # bf16 activations when the producer already emits them.
    if tail_bf16:
        wtail = wtail.astype(jnp.bfloat16)     # tiny (96 KiB) one-off convert

    lane = 128
    x_tile_bytes = TB * (-(-F_IN // lane) * lane) * 4       # 157 -> 256 lanes
    vmem_bytes = (
        B * H * 4                      # resident activation slab
        + 2 * x_tile_bytes             # double-buffered streamed x tiles
        + 2 * TB * H * 4               # transient tail-chunk temporaries
        + TB * lane * 4                # lane-padded (TB, 2) output staging
        + 2 * (160 * H + 3 * H * H + 16 * H) * 4   # packed params (f32 worst)
        + (2 << 20)                    # compiler scratch headroom
    )
    vmem_limit = int(min(max(vmem_bytes, 32 << 20), 64 << 20))
    # TODO(synk): for very large B (slab > ~32 MiB) switch to a two-pass variant
    # that re-streams x after the BN1 stats instead of keeping the (B, 128)
    # slab resident (matters most on v7x's 64 MiB VMEM).

    grid_spec = pltpu.PrefetchScalarGridSpec(
        num_scalar_prefetch=0,
        grid=(nt,),
        in_specs=[
            pl.BlockSpec((TB, F_IN), lambda i: (i, 0)),      # streamed x tile
            pl.BlockSpec((F_IN, H), lambda i: (0, 0)),        # resident w1t
            pl.BlockSpec((3, H, H), lambda i: (0, 0, 0)),     # resident tail W
            pl.BlockSpec((N_VEC, H), lambda i: (0, 0)),       # b/gamma/beta pack
        ],
        # Output stays in HBM; finalize DMAs (TB, 2) chunks from VMEM staging.
        out_specs=pl.BlockSpec(memory_space=pl.ANY),
        scratch_shapes=[
            pltpu.VMEM((B, H), jnp.float32),        # resident activation slab
            pltpu.VMEM((1, H), jnp.float32),        # BN running sum
            pltpu.VMEM((1, H), jnp.float32),        # BN running sum of squares
            pltpu.VMEM((TB, N_OUT), jnp.float32),   # output staging chunk
            pltpu.SemaphoreType.DMA,                # output DMA semaphore
        ],
    )
    kernel = functools.partial(deepnet_cross_kernel, n_tiles=nt, tile_rows=TB)
    return pl.pallas_call(
        kernel,
        out_shape=jax.ShapeDtypeStruct((B, N_OUT), jnp.float32),
        grid_spec=grid_spec,
        compiler_params=pltpu.CompilerParams(
            # The batch axis carries the streamed BN1 statistics and the
            # resident slab -> sequential ("arbitrary").
            # TODO(synk): on v7x split the batch across the 2 TensorCores
            # (per-core partial stats + CMEM reduction) for ~2x.
            dimension_semantics=("arbitrary",),
            vmem_limit_bytes=vmem_limit,
        ),
    )(x, w1t, wtail, vecs)


def pack_params(p):
    """Pre-transpose to (in, out), zero-pad to lane width H, pack into 3 arrays.

    INVARIANT the kernel relies on: every padded lane of the weights, biases
    and BN gammas is exactly zero.  Zero gamma folds to scale 0 (killing any
    rsqrt(eps) garbage), and zero weight *rows* for padded input lanes kill the
    sigmoid(0)=0.5 garbage columns before the next matmul.
    """
    w1t = jnp.zeros((F_IN, H), jnp.float32).at[:, :N_HID].set(p["w1"].T)

    def sq(w):  # (out, in) -> zero-padded (H, H) in (in, out) layout
        out_f, in_f = w.shape
        return jnp.zeros((H, H), jnp.float32).at[:in_f, :out_f].set(w.T)

    wtail = jnp.stack([sq(p["w2"]), sq(p["w3"]), sq(p["w4"])])

    def vec(v):
        v = v.reshape(-1)
        return jnp.zeros((H,), jnp.float32).at[:v.shape[0]].set(v)

    vecs = jnp.stack([
        vec(p["b1"]), vec(p["g1"]), vec(p["be1"]),
        vec(p["b2"]), vec(p["g2"]), vec(p["be2"]),
        vec(p["b3"]), vec(p["g3"]), vec(p["be3"]),
        vec(p["b4"]),
    ])
    return w1t, wtail, vecs


def init_params(key):
    """Deterministic init mimicking PyTorch defaults (U(-1/sqrt(fan_in), +))."""
    def linear(key, out_f, in_f):
        kw, kb = jax.random.split(key)
        bound = 1.0 / jnp.sqrt(in_f)
        w = jax.random.uniform(kw, (out_f, in_f), jnp.float32, -bound, bound)
        b = jax.random.uniform(kb, (1, out_f), jnp.float32, -bound, bound)
        return w, b

    k1, k2, k3, k4 = jax.random.split(key, 4)
    w1, b1 = linear(k1, 10, 157)
    w2, b2 = linear(k2, 10, 10)
    w3, b3 = linear(k3, 10, 10)
    w4, b4 = linear(k4, 2, 10)
    ones10 = jnp.ones((1, 10), jnp.float32)
    zeros10 = jnp.zeros((1, 10), jnp.float32)
    return dict(
        w1=w1, b1=b1, g1=ones10, be1=zeros10,
        w2=w2, b2=b2, g2=ones10, be2=zeros10,
        w3=w3, b3=b3, g3=ones10, be3=zeros10,
        w4=w4, b4=b4,
    )


def reference_forward(x, p):
    """Pure-JAX reference mirroring PyTorch training-mode BatchNorm1d."""
    def bn(h, g, be):
        m = jnp.mean(h, axis=0, keepdims=True)
        v = jnp.mean((h - m) ** 2, axis=0, keepdims=True)   # biased variance
        return (h - m) / jnp.sqrt(v + EPS) * g + be

    h = jax.nn.sigmoid(bn(x @ p["w1"].T + p["b1"], p["g1"], p["be1"]))
    h = jax.nn.sigmoid(bn(h @ p["w2"].T + p["b2"], p["g2"], p["be2"]))
    h = jax.nn.sigmoid(bn(h @ p["w3"].T + p["b3"], p["g3"], p["be3"]))
    return jax.nn.sigmoid(h @ p["w4"].T + p["b4"])


if __name__ == "__main__":
    key = jax.random.PRNGKey(0)
    kx, kp = jax.random.split(key)

    B = 256
    x = jax.random.normal(kx, (B, F_IN), jnp.float32)
    params = init_params(kp)
    w1t, wtail, vecs = pack_params(params)
    ref = reference_forward(x, params)

    # Exact f32 path; tb=128 forces 2 fc1 tiles / 2 finalize chunks so the
    # streamed-stats and chunked-tail code paths are exercised.
    out = jax.block_until_ready(
        deepnet_cross_forward(x, w1t, wtail, vecs, tb=128))
    assert out.shape == (B, N_OUT)
    err = float(jnp.max(jnp.abs(out - ref)))
    assert jnp.allclose(out, ref, atol=5e-5, rtol=5e-5), err

    # Fast bf16-tail path (default tb -> single whole-batch tile fallback),
    # relaxed tolerance as recommended by the review.
    out_bf = jax.block_until_ready(
        deepnet_cross_forward(x, w1t, wtail, vecs, tail_bf16=True))
    err_bf = float(jnp.max(jnp.abs(out_bf - ref)))
    assert jnp.allclose(out_bf, ref, atol=3e-2, rtol=3e-2), err_bf

    print("KERNEL_OK")
</pallas_src>

<mosaic_0001>
module attributes {stable_mosaic.version = 11 : i64} {
  func.func @deepnet_cross_kernel(%arg0: i32, %arg1: memref<128x157xf32, #tpu.memory_space<vmem>>, %arg2: memref<157x128xf32, #tpu.memory_space<vmem>>, %arg3: memref<3x128x128xf32, #tpu.memory_space<vmem>>, %arg4: memref<10x128xf32, #tpu.memory_space<vmem>>, %arg5: memref<256x2xf32, #tpu.memory_space<any>>, %arg6: memref<256x128xf32, #tpu.memory_space<vmem>>, %arg7: memref<1x128xf32, #tpu.memory_space<vmem>>, %arg8: memref<1x128xf32, #tpu.memory_space<vmem>>, %arg9: memref<128x2xf32, #tpu.memory_space<vmem>>, %arg10: memref<!tpu.dma_semaphore, #tpu.memory_space<semaphore_mem>>) attributes {dimension_semantics = [#tpu.dimension_semantics<arbitrary>], iteration_bounds = array<i64: 2>, scalar_prefetch = 0 : i64, scratch_operands = 5 : i64, tpu.core_type = #tpu.core_type<tc>, window_params = [{transform_indices = @transform_0, window_bounds = array<i64: 128, 157>}, {pipeline_mode = #tpu.pipeline_mode<synchronous>, transform_indices = @transform_1, window_bounds = array<i64: 157, 128>}, {pipeline_mode = #tpu.pipeline_mode<synchronous>, transform_indices = @transform_2, window_bounds = array<i64: 3, 128, 128>}, {pipeline_mode = #tpu.pipeline_mode<synchronous>, transform_indices = @transform_3, window_bounds = array<i64: 10, 128>}, {}]} {
    %c0_i32 = arith.constant 0 : i32
    %0 = arith.cmpi eq, %arg0, %c0_i32 : i32
    %1 = arith.extui %0 : i1 to i32
    %c0_i32_0 = arith.constant 0 : i32
    %2 = arith.cmpi ne, %1, %c0_i32_0 : i32
    scf.if %2 {
      %cst_18 = arith.constant 0.000000e+00 : f32
      %27 = vector.broadcast %cst_18 : f32 to vector<1x128xf32>
      %c0_19 = arith.constant 0 : index
      %c0_20 = arith.constant 0 : index
      %28 = vector.load %arg7[%c0_19, %c0_20] : memref<1x128xf32, #tpu.memory_space<vmem>>, vector<1x128xf32>
      tpu.vector_store %arg7[%c0_19, %c0_20], %27 {strides = array<i32>} : memref<1x128xf32, #tpu.memory_space<vmem>>, vector<1x128xf32>,
      %cst_21 = arith.constant 0.000000e+00 : f32
      %29 = vector.broadcast %cst_21 : f32 to vector<1x128xf32>
      %c0_22 = arith.constant 0 : index
      %c0_23 = arith.constant 0 : index
      %30 = vector.load %arg8[%c0_22, %c0_23] : memref<1x128xf32, #tpu.memory_space<vmem>>, vector<1x128xf32>
      tpu.vector_store %arg8[%c0_22, %c0_23], %29 {strides = array<i32>} : memref<1x128xf32, #tpu.memory_space<vmem>>, vector<1x128xf32>,
    } else {
    }
    %c0 = arith.constant 0 : index
    %c0_1 = arith.constant 0 : index
    %3 = vector.load %arg1[%c0, %c0_1] : memref<128x157xf32, #tpu.memory_space<vmem>>, vector<128x157xf32>
    %c0_2 = arith.constant 0 : index
    %c0_3 = arith.constant 0 : index
    %4 = vector.load %arg2[%c0_2, %c0_3] : memref<157x128xf32, #tpu.memory_space<vmem>>, vector<157x128xf32>
    %cst = arith.constant dense<0.000000e+00> : vector<128x128xf32>
    %5 = tpu.matmul %3, %4, %cst {dimension_numbers = #tpu.dot_dimension_numbers<[1], [0], [0], [1], [0, 0, 1, 1], [], []>} : vector<128x157xf32>, vector<157x128xf32>, vector<128x128xf32> -> vector<128x128xf32>
    %c0_4 = arith.constant 0 : index
    %c0_5 = arith.constant 0 : index
    %6 = vector.load %arg4[%c0_4, %c0_5] : memref<10x128xf32, #tpu.memory_space<vmem>>, vector<1x128xf32>
    %7 = vector.broadcast %6 : vector<1x128xf32> to vector<128x128xf32>
    %8 = arith.addf %5, %7 : vector<128x128xf32>
    %c128_i32 = arith.constant 128 : i32
    %9 = arith.muli %arg0, %c128_i32 : i32
    %10 = tpu.assume_multiple %9, 128 : i32
    %11 = arith.index_cast %10 : i32 to index
    %c0_6 = arith.constant 0 : index
    %12 = vector.load %arg6[%11, %c0_6] : memref<256x128xf32, #tpu.memory_space<vmem>>, vector<128x128xf32>
    tpu.vector_store %arg6[%11, %c0_6], %8 {strides = array<i32>} : memref<256x128xf32, #tpu.memory_space<vmem>>, vector<128x128xf32>,
    %c0_7 = arith.constant 0 : index
    %c0_8 = arith.constant 0 : index
    %13 = vector.load %arg7[%c0_7, %c0_8] : memref<1x128xf32, #tpu.memory_space<vmem>>, vector<1x128xf32>
    %cst_9 = arith.constant dense<0.000000e+00> : vector<128xf32>
    %14 = vector.multi_reduction <add>, %8, %cst_9 [0] : vector<128x128xf32> to vector<128xf32>
    %15 = vector.shape_cast %14 : vector<128xf32> to vector<1x128xf32>
    %16 = arith.addf %13, %15 : vector<1x128xf32>
    %c0_10 = arith.constant 0 : index
    %c0_11 = arith.constant 0 : index
    %17 = vector.load %arg7[%c0_10, %c0_11] : memref<1x128xf32, #tpu.memory_space<vmem>>, vector<1x128xf32>
    tpu.vector_store %arg7[%c0_10, %c0_11], %16 {strides = array<i32>} : memref<1x128xf32, #tpu.memory_space<vmem>>, vector<1x128xf32>,
    %c0_12 = arith.constant 0 : index
    %c0_13 = arith.constant 0 : index
    %18 = vector.load %arg8[%c0_12, %c0_13] : memref<1x128xf32, #tpu.memory_space<vmem>>, vector<1x128xf32>
    %19 = arith.mulf %8, %8 : vector<128x128xf32>
    %cst_14 = arith.constant dense<0.000000e+00> : vector<128xf32>
    %20 = vector.multi_reduction <add>, %19, %cst_14 [0] : vector<128x128xf32> to vector<128xf32>
    %21 = vector.shape_cast %20 : vector<128xf32> to vector<1x128xf32>
    %22 = arith.addf %18, %21 : vector<1x128xf32>
    %c0_15 = arith.constant 0 : index
    %c0_16 = arith.constant 0 : index
    %23 = vector.load %arg8[%c0_15, %c0_16] : memref<1x128xf32, #tpu.memory_space<vmem>>, vector<1x128xf32>
    tpu.vector_store %arg8[%c0_15, %c0_16], %22 {strides = array<i32>} : memref<1x128xf32, #tpu.memory_space<vmem>>, vector<1x128xf32>,
    %c1_i32 = arith.constant 1 : i32
    %24 = arith.cmpi eq, %arg0, %c1_i32 : i32
    %25 = arith.extui %24 : i1 to i32
    %c0_i32_17 = arith.constant 0 : i32
    %26 = arith.cmpi ne, %25, %c0_i32_17 : i32
    scf.if %26 {
      %c0_18 = arith.constant 0 : index
      %c0_19 = arith.constant 0 : index
      %27 = vector.load %arg7[%c0_18, %c0_19] : memref<1x128xf32, #tpu.memory_space<vmem>>, vector<1x128xf32>
      %cst_20 = arith.constant 3.906250e-03 : f32
      %28 = vector.broadcast %cst_20 : f32 to vector<1x128xf32>
      %29 = arith.mulf %27, %28 : vector<1x128xf32>
      %c0_21 = arith.constant 0 : index
      %c0_22 = arith.constant 0 : index
      %30 = vector.load %arg8[%c0_21, %c0_22] : memref<1x128xf32, #tpu.memory_space<vmem>>, vector<1x128xf32>
      %cst_23 = arith.constant 3.906250e-03 : f32
      %31 = vector.broadcast %cst_23 : f32 to vector<1x128xf32>
      %32 = arith.mulf %30, %31 : vector<1x128xf32>
      %33 = arith.mulf %29, %29 : vector<1x128xf32>
      %34 = arith.subf %32, %33 : vector<1x128xf32>
      %c1 = arith.constant 1 : index
      %c0_24 = arith.constant 0 : index
      %35 = vector.load %arg4[%c1, %c0_24] : memref<10x128xf32, #tpu.memory_space<vmem>>, vector<1x128xf32>
      %c2 = arith.constant 2 : index
      %c0_25 = arith.constant 0 : index
      %36 = vector.load %arg4[%c2, %c0_25] : memref<10x128xf32, #tpu.memory_space<vmem>>, vector<1x128xf32>
      %cst_26 = arith.constant 0.000000e+00 : f32
      %37 = vector.broadcast %cst_26 : f32 to vector<1x128xf32>
      %38 = arith.maximumf %34, %37 : vector<1x128xf32>
      %cst_27 = arith.constant 9.99999974E-6 : f32
      %39 = vector.broadcast %cst_27 : f32 to vector<1x128xf32>
      %40 = arith.addf %38, %39 : vector<1x128xf32>
      %41 = math.rsqrt %40 : vector<1x128xf32>
      %42 = arith.mulf %35, %41 : vector<1x128xf32>
      %43 = arith.mulf %29, %42 : vector<1x128xf32>
      %44 = arith.subf %36, %43 : vector<1x128xf32>
      %c0_i32_28 = arith.constant 0 : i32
      %c2_i32 = arith.constant 2 : i32
      %45 = arith.addi %c0_i32_28, %c2_i32 : i32
      %c1_i32_29 = arith.constant 1 : i32
      scf.for %arg11 = %c0_i32_28 to %45 step %c1_i32_29  : i32 {
        %c1_i32_95 = arith.constant 1 : i32
        %104 = arith.muli %arg11, %c1_i32_95 : i32
        %c0_i32_96 = arith.constant 0 : i32
        %105 = arith.addi %c0_i32_96, %104 : i32
        %c128_i32_97 = arith.constant 128 : i32
        %106 = arith.muli %105, %c128_i32_97 : i32
        %107 = tpu.assume_multiple %106, 128 : i32
        %108 = arith.index_cast %107 : i32 to index
        %c0_98 = arith.constant 0 : index
        %109 = vector.load %arg6[%108, %c0_98] : memref<256x128xf32, #tpu.memory_space<vmem>>, vector<128x128xf32>
        %110 = vector.broadcast %42 : vector<1x128xf32> to vector<128x128xf32>
        %111 = arith.mulf %109, %110 : vector<128x128xf32>
        %112 = vector.broadcast %44 : vector<1x128xf32> to vector<128x128xf32>
        %113 = arith.addf %111, %112 : vector<128x128xf32>
        %cst_99 = arith.constant 5.000000e-01 : f32
        %114 = vector.broadcast %cst_99 : f32 to vector<128x128xf32>
        %115 = arith.mulf %114, %113 : vector<128x128xf32>
        %116 = math.tanh %115 : vector<128x128xf32>
        %cst_100 = arith.constant 1.000000e+00 : f32
        %117 = vector.broadcast %cst_100 : f32 to vector<128x128xf32>
        %118 = arith.addf %116, %117 : vector<128x128xf32>
        %cst_101 = arith.constant 5.000000e-01 : f32
        %119 = vector.broadcast %cst_101 : f32 to vector<128x128xf32>
        %120 = arith.mulf %119, %118 : vector<128x128xf32>
        %121 = arith.index_cast %107 : i32 to index
        %c0_102 = arith.constant 0 : index
        %122 = vector.load %arg6[%121, %c0_102] : memref<256x128xf32, #tpu.memory_space<vmem>>, vector<128x128xf32>
        tpu.vector_store %arg6[%121, %c0_102], %120 {strides = array<i32>} : memref<256x128xf32, #tpu.memory_space<vmem>>, vector<128x128xf32>,
      }
      %c2_i32_30 = arith.constant 2 : i32
      %c3 = arith.constant 3 : index
      %c0_31 = arith.constant 0 : index
      %46 = vector.load %arg4[%c3, %c0_31] : memref<10x128xf32, #tpu.memory_space<vmem>>, vector<1x128xf32>
      %c4 = arith.constant 4 : index
      %c0_32 = arith.constant 0 : index
      %47 = vector.load %arg4[%c4, %c0_32] : memref<10x128xf32, #tpu.memory_space<vmem>>, vector<1x128xf32>
      %c5 = arith.constant 5 : index
      %c0_33 = arith.constant 0 : index
      %48 = vector.load %arg4[%c5, %c0_33] : memref<10x128xf32, #tpu.memory_space<vmem>>, vector<1x128xf32>
      %c0_34 = arith.constant 0 : index
      %c0_35 = arith.constant 0 : index
      %c0_36 = arith.constant 0 : index
      %49 = vector.load %arg3[%c0_34, %c0_35, %c0_36] : memref<3x128x128xf32, #tpu.memory_space<vmem>>, vector<1x128x128xf32>
      %50 = vector.shape_cast %49 : vector<1x128x128xf32> to vector<128x128xf32>
      %cst_37 = arith.constant 0.000000e+00 : f32
      %51 = vector.broadcast %cst_37 : f32 to vector<1x128xf32>
      %c0_38 = arith.constant 0 : index
      %c0_39 = arith.constant 0 : index
      %52 = vector.load %arg7[%c0_38, %c0_39] : memref<1x128xf32, #tpu.memory_space<vmem>>, vector<1x128xf32>
      tpu.vector_store %arg7[%c0_38, %c0_39], %51 {strides = array<i32>} : memref<1x128xf32, #tpu.memory_space<vmem>>, vector<1x128xf32>,
      %cst_40 = arith.constant 0.000000e+00 : f32
      %53 = vector.broadcast %cst_40 : f32 to vector<1x128xf32>
      %c0_41 = arith.constant 0 : index
      %c0_42 = arith.constant 0 : index
      %54 = vector.load %arg8[%c0_41, %c0_42] : memref<1x128xf32, #tpu.memory_space<vmem>>, vector<1x128xf32>
      tpu.vector_store %arg8[%c0_41, %c0_42], %53 {strides = array<i32>} : memref<1x128xf32, #tpu.memory_space<vmem>>, vector<1x128xf32>,
      %c0_i32_43 = arith.constant 0 : i32
      %c2_i32_44 = arith.constant 2 : i32
      %55 = arith.addi %c0_i32_43, %c2_i32_44 : i32
      %c1_i32_45 = arith.constant 1 : i32
      scf.for %arg11 = %c0_i32_43 to %55 step %c1_i32_45  : i32 {
        %c1_i32_95 = arith.constant 1 : i32
        %104 = arith.muli %arg11, %c1_i32_95 : i32
        %c0_i32_96 = arith.constant 0 : i32
        %105 = arith.addi %c0_i32_96, %104 : i32
        %c128_i32_97 = arith.constant 128 : i32
        %106 = arith.muli %105, %c128_i32_97 : i32
        %107 = tpu.assume_multiple %106, 128 : i32
        %108 = arith.index_cast %107 : i32 to index
        %c0_98 = arith.constant 0 : index
        %109 = vector.load %arg6[%108, %c0_98] : memref<256x128xf32, #tpu.memory_space<vmem>>, vector<128x128xf32>
        %cst_99 = arith.constant dense<0.000000e+00> : vector<128x128xf32>
        %110 = tpu.matmul %109, %50, %cst_99 {dimension_numbers = #tpu.dot_dimension_numbers<[1], [0], [0], [1], [0, 0, 1, 1], [], []>} : vector<128x128xf32>, vector<128x128xf32>, vector<128x128xf32> -> vector<128x128xf32>
        %111 = vector.broadcast %46 : vector<1x128xf32> to vector<128x128xf32>
        %112 = arith.addf %110, %111 : vector<128x128xf32>
        %c0_100 = arith.constant 0 : index
        %c0_101 = arith.constant 0 : index
        %113 = vector.load %arg7[%c0_100, %c0_101] : memref<1x128xf32, #tpu.memory_space<vmem>>, vector<1x128xf32>
        %cst_102 = arith.constant dense<0.000000e+00> : vector<128xf32>
        %114 = vector.multi_reduction <add>, %112, %cst_102 [0] : vector<128x128xf32> to vector<128xf32>
        %115 = vector.shape_cast %114 : vector<128xf32> to vector<1x128xf32>
        %116 = arith.addf %113, %115 : vector<1x128xf32>
        %c0_103 = arith.constant 0 : index
        %c0_104 = arith.constant 0 : index
        %117 = vector.load %arg7[%c0_103, %c0_104] : memref<1x128xf32, #tpu.memory_space<vmem>>, vector<1x128xf32>
        tpu.vector_store %arg7[%c0_103, %c0_104], %116 {strides = array<i32>} : memref<1x128xf32, #tpu.memory_space<vmem>>, vector<1x128xf32>,
        %c0_105 = arith.constant 0 : index
        %c0_106 = arith.constant 0 : index
        %118 = vector.load %arg8[%c0_105, %c0_106] : memref<1x128xf32, #tpu.memory_space<vmem>>, vector<1x128xf32>
        %119 = arith.mulf %112, %112 : vector<128x128xf32>
        %cst_107 = arith.constant dense<0.000000e+00> : vector<128xf32>
        %120 = vector.multi_reduction <add>, %119, %cst_107 [0] : vector<128x128xf32> to vector<128xf32>
        %121 = vector.shape_cast %120 : vector<128xf32> to vector<1x128xf32>
        %122 = arith.addf %118, %121 : vector<1x128xf32>
        %c0_108 = arith.constant 0 : index
        %c0_109 = arith.constant 0 : index
        %123 = vector.load %arg8[%c0_108, %c0_109] : memref<1x128xf32, #tpu.memory_space<vmem>>, vector<1x128xf32>
        tpu.vector_store %arg8[%c0_108, %c0_109], %122 {strides = array<i32>} : memref<1x128xf32, #tpu.memory_space<vmem>>, vector<1x128xf32>,
        %124 = arith.index_cast %107 : i32 to index
        %c0_110 = arith.constant 0 : index
        %125 = vector.load %arg6[%124, %c0_110] : memref<256x128xf32, #tpu.memory_space<vmem>>, vector<128x128xf32>
        tpu.vector_store %arg6[%124, %c0_110], %112 {strides = array<i32>} : memref<256x128xf32, #tpu.memory_space<vmem>>, vector<128x128xf32>,
      }
      %c2_i32_46 = arith.constant 2 : i32
      %c0_47 = arith.constant 0 : index
      %c0_48 = arith.constant 0 : index
      %56 = vector.load %arg7[%c0_47, %c0_48] : memref<1x128xf32, #tpu.memory_space<vmem>>, vector<1x128xf32>
      %cst_49 = arith.constant 3.906250e-03 : f32
      %57 = vector.broadcast %cst_49 : f32 to vector<1x128xf32>
      %58 = arith.mulf %56, %57 : vector<1x128xf32>
      %c0_50 = arith.constant 0 : index
      %c0_51 = arith.constant 0 : index
      %59 = vector.load %arg8[%c0_50, %c0_51] : memref<1x128xf32, #tpu.memory_space<vmem>>, vector<1x128xf32>
      %cst_52 = arith.constant 3.906250e-03 : f32
      %60 = vector.broadcast %cst_52 : f32 to vector<1x128xf32>
      %61 = arith.mulf %59, %60 : vector<1x128xf32>
      %62 = arith.mulf %58, %58 : vector<1x128xf32>
      %63 = arith.subf %61, %62 : vector<1x128xf32>
      %cst_53 = arith.constant 0.000000e+00 : f32
      %64 = vector.broadcast %cst_53 : f32 to vector<1x128xf32>
      %65 = arith.maximumf %63, %64 : vector<1x128xf32>
      %cst_54 = arith.constant 9.99999974E-6 : f32
      %66 = vector.broadcast %cst_54 : f32 to vector<1x128xf32>
      %67 = arith.addf %65, %66 : vector<1x128xf32>
      %68 = math.rsqrt %67 : vector<1x128xf32>
      %69 = arith.mulf %47, %68 : vector<1x128xf32>
      %70 = arith.mulf %58, %69 : vector<1x128xf32>
      %71 = arith.subf %48, %70 : vector<1x128xf32>
      %c0_i32_55 = arith.constant 0 : i32
      %c2_i32_56 = arith.constant 2 : i32
      %72 = arith.addi %c0_i32_55, %c2_i32_56 : i32
      %c1_i32_57 = arith.constant 1 : i32
      scf.for %arg11 = %c0_i32_55 to %72 step %c1_i32_57  : i32 {
        %c1_i32_95 = arith.constant 1 : i32
        %104 = arith.muli %arg11, %c1_i32_95 : i32
        %c0_i32_96 = arith.constant 0 : i32
        %105 = arith.addi %c0_i32_96, %104 : i32
        %c128_i32_97 = arith.constant 128 : i32
        %106 = arith.muli %105, %c128_i32_97 : i32
        %107 = tpu.assume_multiple %106, 128 : i32
        %108 = arith.index_cast %107 : i32 to index
        %c0_98 = arith.constant 0 : index
        %109 = vector.load %arg6[%108, %c0_98] : memref<256x128xf32, #tpu.memory_space<vmem>>, vector<128x128xf32>
        %110 = vector.broadcast %69 : vector<1x128xf32> to vector<128x128xf32>
        %111 = arith.mulf %109, %110 : vector<128x128xf32>
        %112 = vector.broadcast %71 : vector<1x128xf32> to vector<128x128xf32>
        %113 = arith.addf %111, %112 : vector<128x128xf32>
        %cst_99 = arith.constant 5.000000e-01 : f32
        %114 = vector.broadcast %cst_99 : f32 to vector<128x128xf32>
        %115 = arith.mulf %114, %113 : vector<128x128xf32>
        %116 = math.tanh %115 : vector<128x128xf32>
        %cst_100 = arith.constant 1.000000e+00 : f32
        %117 = vector.broadcast %cst_100 : f32 to vector<128x128xf32>
        %118 = arith.addf %116, %117 : vector<128x128xf32>
        %cst_101 = arith.constant 5.000000e-01 : f32
        %119 = vector.broadcast %cst_101 : f32 to vector<128x128xf32>
        %120 = arith.mulf %119, %118 : vector<128x128xf32>
        %121 = arith.index_cast %107 : i32 to index
        %c0_102 = arith.constant 0 : index
        %122 = vector.load %arg6[%121, %c0_102] : memref<256x128xf32, #tpu.memory_space<vmem>>, vector<128x128xf32>
        tpu.vector_store %arg6[%121, %c0_102], %120 {strides = array<i32>} : memref<256x128xf32, #tpu.memory_space<vmem>>, vector<128x128xf32>,
      }
      %c2_i32_58 = arith.constant 2 : i32
      %c6 = arith.constant 6 : index
      %c0_59 = arith.constant 0 : index
      %73 = vector.load %arg4[%c6, %c0_59] : memref<10x128xf32, #tpu.memory_space<vmem>>, vector<1x128xf32>
      %c7 = arith.constant 7 : index
      %c0_60 = arith.constant 0 : index
      %74 = vector.load %arg4[%c7, %c0_60] : memref<10x128xf32, #tpu.memory_space<vmem>>, vector<1x128xf32>
      %c8 = arith.constant 8 : index
      %c0_61 = arith.constant 0 : index
      %75 = vector.load %arg4[%c8, %c0_61] : memref<10x128xf32, #tpu.memory_space<vmem>>, vector<1x128xf32>
      %c1_62 = arith.constant 1 : index
      %c0_63 = arith.constant 0 : index
      %c0_64 = arith.constant 0 : index
      %76 = vector.load %arg3[%c1_62, %c0_63, %c0_64] : memref<3x128x128xf32, #tpu.memory_space<vmem>>, vector<1x128x128xf32>
      %77 = vector.shape_cast %76 : vector<1x128x128xf32> to vector<128x128xf32>
      %cst_65 = arith.constant 0.000000e+00 : f32
      %78 = vector.broadcast %cst_65 : f32 to vector<1x128xf32>
      %c0_66 = arith.constant 0 : index
      %c0_67 = arith.constant 0 : index
      %79 = vector.load %arg7[%c0_66, %c0_67] : memref<1x128xf32, #tpu.memory_space<vmem>>, vector<1x128xf32>
      tpu.vector_store %arg7[%c0_66, %c0_67], %78 {strides = array<i32>} : memref<1x128xf32, #tpu.memory_space<vmem>>, vector<1x128xf32>,
      %cst_68 = arith.constant 0.000000e+00 : f32
      %80 = vector.broadcast %cst_68 : f32 to vector<1x128xf32>
      %c0_69 = arith.constant 0 : index
      %c0_70 = arith.constant 0 : index
      %81 = vector.load %arg8[%c0_69, %c0_70] : memref<1x128xf32, #tpu.memory_space<vmem>>, vector<1x128xf32>
      tpu.vector_store %arg8[%c0_69, %c0_70], %80 {strides = array<i32>} : memref<1x128xf32, #tpu.memory_space<vmem>>, vector<1x128xf32>,
      %c0_i32_71 = arith.constant 0 : i32
      %c2_i32_72 = arith.constant 2 : i32
      %82 = arith.addi %c0_i32_71, %c2_i32_72 : i32
      %c1_i32_73 = arith.constant 1 : i32
      scf.for %arg11 = %c0_i32_71 to %82 step %c1_i32_73  : i32 {
        %c1_i32_95 = arith.constant 1 : i32
        %104 = arith.muli %arg11, %c1_i32_95 : i32
        %c0_i32_96 = arith.constant 0 : i32
        %105 = arith.addi %c0_i32_96, %104 : i32
        %c128_i32_97 = arith.constant 128 : i32
        %106 = arith.muli %105, %c128_i32_97 : i32
        %107 = tpu.assume_multiple %106, 128 : i32
        %108 = arith.index_cast %107 : i32 to index
        %c0_98 = arith.constant 0 : index
        %109 = vector.load %arg6[%108, %c0_98] : memref<256x128xf32, #tpu.memory_space<vmem>>, vector<128x128xf32>
        %cst_99 = arith.constant dense<0.000000e+00> : vector<128x128xf32>
        %110 = tpu.matmul %109, %77, %cst_99 {dimension_numbers = #tpu.dot_dimension_numbers<[1], [0], [0], [1], [0, 0, 1, 1], [], []>} : vector<128x128xf32>, vector<128x128xf32>, vector<128x128xf32> -> vector<128x128xf32>
        %111 = vector.broadcast %73 : vector<1x128xf32> to vector<128x128xf32>
        %112 = arith.addf %110, %111 : vector<128x128xf32>
        %c0_100 = arith.constant 0 : index
        %c0_101 = arith.constant 0 : index
        %113 = vector.load %arg7[%c0_100, %c0_101] : memref<1x128xf32, #tpu.memory_space<vmem>>, vector<1x128xf32>
        %cst_102 = arith.constant dense<0.000000e+00> : vector<128xf32>
        %114 = vector.multi_reduction <add>, %112, %cst_102 [0] : vector<128x128xf32> to vector<128xf32>
        %115 = vector.shape_cast %114 : vector<128xf32> to vector<1x128xf32>
        %116 = arith.addf %113, %115 : vector<1x128xf32>
        %c0_103 = arith.constant 0 : index
        %c0_104 = arith.constant 0 : index
        %117 = vector.load %arg7[%c0_103, %c0_104] : memref<1x128xf32, #tpu.memory_space<vmem>>, vector<1x128xf32>
        tpu.vector_store %arg7[%c0_103, %c0_104], %116 {strides = array<i32>} : memref<1x128xf32, #tpu.memory_space<vmem>>, vector<1x128xf32>,
        %c0_105 = arith.constant 0 : index
        %c0_106 = arith.constant 0 : index
        %118 = vector.load %arg8[%c0_105, %c0_106] : memref<1x128xf32, #tpu.memory_space<vmem>>, vector<1x128xf32>
        %119 = arith.mulf %112, %112 : vector<128x128xf32>
        %cst_107 = arith.constant dense<0.000000e+00> : vector<128xf32>
        %120 = vector.multi_reduction <add>, %119, %cst_107 [0] : vector<128x128xf32> to vector<128xf32>
        %121 = vector.shape_cast %120 : vector<128xf32> to vector<1x128xf32>
        %122 = arith.addf %118, %121 : vector<1x128xf32>
        %c0_108 = arith.constant 0 : index
        %c0_109 = arith.constant 0 : index
        %123 = vector.load %arg8[%c0_108, %c0_109] : memref<1x128xf32, #tpu.memory_space<vmem>>, vector<1x128xf32>
        tpu.vector_store %arg8[%c0_108, %c0_109], %122 {strides = array<i32>} : memref<1x128xf32, #tpu.memory_space<vmem>>, vector<1x128xf32>,
        %124 = arith.index_cast %107 : i32 to index
        %c0_110 = arith.constant 0 : index
        %125 = vector.load %arg6[%124, %c0_110] : memref<256x128xf32, #tpu.memory_space<vmem>>, vector<128x128xf32>
        tpu.vector_store %arg6[%124, %c0_110], %112 {strides = array<i32>} : memref<256x128xf32, #tpu.memory_space<vmem>>, vector<128x128xf32>,
      }
      %c2_i32_74 = arith.constant 2 : i32
      %c0_75 = arith.constant 0 : index
      %c0_76 = arith.constant 0 : index
      %83 = vector.load %arg7[%c0_75, %c0_76] : memref<1x128xf32, #tpu.memory_space<vmem>>, vector<1x128xf32>
      %cst_77 = arith.constant 3.906250e-03 : f32
      %84 = vector.broadcast %cst_77 : f32 to vector<1x128xf32>
      %85 = arith.mulf %83, %84 : vector<1x128xf32>
      %c0_78 = arith.constant 0 : index
      %c0_79 = arith.constant 0 : index
      %86 = vector.load %arg8[%c0_78, %c0_79] : memref<1x128xf32, #tpu.memory_space<vmem>>, vector<1x128xf32>
      %cst_80 = arith.constant 3.906250e-03 : f32
      %87 = vector.broadcast %cst_80 : f32 to vector<1x128xf32>
      %88 = arith.mulf %86, %87 : vector<1x128xf32>
      %89 = arith.mulf %85, %85 : vector<1x128xf32>
      %90 = arith.subf %88, %89 : vector<1x128xf32>
      %cst_81 = arith.constant 0.000000e+00 : f32
      %91 = vector.broadcast %cst_81 : f32 to vector<1x128xf32>
      %92 = arith.maximumf %90, %91 : vector<1x128xf32>
      %cst_82 = arith.constant 9.99999974E-6 : f32
      %93 = vector.broadcast %cst_82 : f32 to vector<1x128xf32>
      %94 = arith.addf %92, %93 : vector<1x128xf32>
      %95 = math.rsqrt %94 : vector<1x128xf32>
      %96 = arith.mulf %74, %95 : vector<1x128xf32>
      %97 = arith.mulf %85, %96 : vector<1x128xf32>
      %98 = arith.subf %75, %97 : vector<1x128xf32>
      %c0_i32_83 = arith.constant 0 : i32
      %c2_i32_84 = arith.constant 2 : i32
      %99 = arith.addi %c0_i32_83, %c2_i32_84 : i32
      %c1_i32_85 = arith.constant 1 : i32
      scf.for %arg11 = %c0_i32_83 to %99 step %c1_i32_85  : i32 {
        %c1_i32_95 = arith.constant 1 : i32
        %104 = arith.muli %arg11, %c1_i32_95 : i32
        %c0_i32_96 = arith.constant 0 : i32
        %105 = arith.addi %c0_i32_96, %104 : i32
        %c128_i32_97 = arith.constant 128 : i32
        %106 = arith.muli %105, %c128_i32_97 : i32
        %107 = tpu.assume_multiple %106, 128 : i32
        %108 = arith.index_cast %107 : i32 to index
        %c0_98 = arith.constant 0 : index
        %109 = vector.load %arg6[%108, %c0_98] : memref<256x128xf32, #tpu.memory_space<vmem>>, vector<128x128xf32>
        %110 = vector.broadcast %96 : vector<1x128xf32> to vector<128x128xf32>
        %111 = arith.mulf %109, %110 : vector<128x128xf32>
        %112 = vector.broadcast %98 : vector<1x128xf32> to vector<128x128xf32>
        %113 = arith.addf %111, %112 : vector<128x128xf32>
        %cst_99 = arith.constant 5.000000e-01 : f32
        %114 = vector.broadcast %cst_99 : f32 to vector<128x128xf32>
        %115 = arith.mulf %114, %113 : vector<128x128xf32>
        %116 = math.tanh %115 : vector<128x128xf32>
        %cst_100 = arith.constant 1.000000e+00 : f32
        %117 = vector.broadcast %cst_100 : f32 to vector<128x128xf32>
        %118 = arith.addf %116, %117 : vector<128x128xf32>
        %cst_101 = arith.constant 5.000000e-01 : f32
        %119 = vector.broadcast %cst_101 : f32 to vector<128x128xf32>
        %120 = arith.mulf %119, %118 : vector<128x128xf32>
        %121 = arith.index_cast %107 : i32 to index
        %c0_102 = arith.constant 0 : index
        %122 = vector.load %arg6[%121, %c0_102] : memref<256x128xf32, #tpu.memory_space<vmem>>, vector<128x128xf32>
        tpu.vector_store %arg6[%121, %c0_102], %120 {strides = array<i32>} : memref<256x128xf32, #tpu.memory_space<vmem>>, vector<128x128xf32>,
      }
      %c2_i32_86 = arith.constant 2 : i32
      %c2_87 = arith.constant 2 : index
      %c0_88 = arith.constant 0 : index
      %c0_89 = arith.constant 0 : index
      %100 = vector.load %arg3[%c2_87, %c0_88, %c0_89] : memref<3x128x128xf32, #tpu.memory_space<vmem>>, vector<1x128x128xf32>
      %101 = vector.shape_cast %100 : vector<1x128x128xf32> to vector<128x128xf32>
      %c9 = arith.constant 9 : index
      %c0_90 = arith.constant 0 : index
      %102 = vector.load %arg4[%c9, %c0_90] : memref<10x128xf32, #tpu.memory_space<vmem>>, vector<1x128xf32>
      %c0_i32_91 = arith.constant 0 : i32
      %c2_i32_92 = arith.constant 2 : i32
      %103 = arith.addi %c0_i32_91, %c2_i32_92 : i32
      %c1_i32_93 = arith.constant 1 : i32
      scf.for %arg11 = %c0_i32_91 to %103 step %c1_i32_93  : i32 {
        %c1_i32_95 = arith.constant 1 : i32
        %104 = arith.muli %arg11, %c1_i32_95 : i32
        %c0_i32_96 = arith.constant 0 : i32
        %105 = arith.addi %c0_i32_96, %104 : i32
        %c128_i32_97 = arith.constant 128 : i32
        %106 = arith.muli %105, %c128_i32_97 : i32
        %107 = tpu.assume_multiple %106, 128 : i32
        %108 = arith.index_cast %107 : i32 to index
        %c0_98 = arith.constant 0 : index
        %109 = vector.load %arg6[%108, %c0_98] : memref<256x128xf32, #tpu.memory_space<vmem>>, vector<128x128xf32>
        %cst_99 = arith.constant dense<0.000000e+00> : vector<128x128xf32>
        %110 = tpu.matmul %109, %101, %cst_99 {dimension_numbers = #tpu.dot_dimension_numbers<[1], [0], [0], [1], [0, 0, 1, 1], [], []>} : vector<128x128xf32>, vector<128x128xf32>, vector<128x128xf32> -> vector<128x128xf32>
        %111 = vector.broadcast %102 : vector<1x128xf32> to vector<128x128xf32>
        %112 = arith.addf %110, %111 : vector<128x128xf32>
        %113 = vector.extract_strided_slice %112 {offsets = [0, 0], sizes = [128, 2], strides = [1, 1]} : vector<128x128xf32> to vector<128x2xf32>
        %cst_100 = arith.constant 5.000000e-01 : f32
        %114 = vector.broadcast %cst_100 : f32 to vector<128x2xf32>
        %115 = arith.mulf %114, %113 : vector<128x2xf32>
        %116 = math.tanh %115 : vector<128x2xf32>
        %cst_101 = arith.constant 1.000000e+00 : f32
        %117 = vector.broadcast %cst_101 : f32 to vector<128x2xf32>
        %118 = arith.addf %116, %117 : vector<128x2xf32>
        %cst_102 = arith.constant 5.000000e-01 : f32
        %119 = vector.broadcast %cst_102 : f32 to vector<128x2xf32>
        %120 = arith.mulf %119, %118 : vector<128x2xf32>
        %c0_103 = arith.constant 0 : index
        %c0_104 = arith.constant 0 : index
        %121 = vector.load %arg9[%c0_103, %c0_104] : memref<128x2xf32, #tpu.memory_space<vmem>>, vector<128x2xf32>
        tpu.vector_store %arg9[%c0_103, %c0_104], %120 {strides = array<i32>} : memref<128x2xf32, #tpu.memory_space<vmem>>, vector<128x2xf32>,
        %c0_i32_105 = arith.constant 0 : i32
        %122 = tpu.memref_slice %arg5[%107, %c0_i32_105] : memref<256x2xf32, #tpu.memory_space<any>> -> memref<128x2xf32, #tpu.memory_space<any>>
        tpu.enqueue_dma source(%arg9 : memref<128x2xf32, #tpu.memory_space<vmem>>) target(%122 : memref<128x2xf32, #tpu.memory_space<any>>) target_semaphore(%arg10 : memref<!tpu.dma_semaphore, #tpu.memory_space<semaphore_mem>>)
        %c0_i32_106 = arith.constant 0 : i32
        %123 = tpu.memref_slice %arg5[%107, %c0_i32_106] : memref<256x2xf32, #tpu.memory_space<any>> -> memref<128x2xf32, #tpu.memory_space<any>>
        tpu.wait_dma2 semaphore(%arg10 : memref<!tpu.dma_semaphore, #tpu.memory_space<semaphore_mem>>) src(%arg9 : memref<128x2xf32, #tpu.memory_space<vmem>>) dst(%123 : memref<128x2xf32, #tpu.memory_space<any>>)
      }
      %c2_i32_94 = arith.constant 2 : i32
    } else {
    }
    return
  }
  func.func @transform_0(%arg0: i32) -> (i32, i32) {
    %c0_i32 = arith.constant 0 : i32
    %c0_i32_0 = arith.constant 0 : i32
    return %arg0, %c0_i32 : i32, i32
  }
  func.func @transform_1(%arg0: i32) -> (i32, i32) {
    %c0_i32 = arith.constant 0 : i32
    %c0_i32_0 = arith.constant 0 : i32
    %c0_i32_1 = arith.constant 0 : i32
    return %c0_i32, %c0_i32_0 : i32, i32
  }
  func.func @transform_2(%arg0: i32) -> (i32, i32, i32) {
    %c0_i32 = arith.constant 0 : i32
    %c0_i32_0 = arith.constant 0 : i32
    %c0_i32_1 = arith.constant 0 : i32
    %c0_i32_2 = arith.constant 0 : i32
    return %c0_i32, %c0_i32_0, %c0_i32_1 : i32, i32, i32
  }
  func.func @transform_3(%arg0: i32) -> (i32, i32) {
    %c0_i32 = arith.constant 0 : i32
    %c0_i32_0 = arith.constant 0 : i32
    %c0_i32_1 = arith.constant 0 : i32
    return %c0_i32, %c0_i32_0 : i32, i32
  }
}

</mosaic_0001>

<bundles_post_ra>
// kernel: deepnet_cross_forward.1
= control target key start
LH: loop header
LB: loop body
LE: loop exit
PB: predicated region body
PF: predicated region fallthrough
CT: control target
= control target key end

     0   :  { %s2164_s15 = smov 0   ;;  %s3333_s0 = inlined_call_operand.vmem [shape: f32[256,157], index: 0, kind: input, shape index: {}]   ;;  %s3334_s1 = inlined_call_operand.vmem [shape: f32[157,128], index: 1, kind: input, shape index: {}]   ;;  %s3335_s2 = inlined_call_operand.vmem [shape: f32[3,128,128], index: 2, kind: input, shape index: {}]   ;;  %s3336_s3 = inlined_call_operand.vmem [shape: f32[10,128], index: 3, kind: input, shape index: {}]   ;;  %s3337_s4 = inlined_call_operand.vmem [shape: f32[256,2], index: 4, kind: output, shape index: {}]  }
   0x1 LB: > { %s2170_s16 = sadd.s32 4294967295, %s2111_s15   ;;  %p1642_p0 = scmp.lt.s32.totalorder %s2111_s15, 1  ;;  %s2111_s15 = sphi %s2164_s15, %s14_s15  }
   0x2   : > { %s1643_s17 = sshll.u32 (!%p1642_p0), %s2170_s16, 4  ;;  %p1646_p2 = scmp.ne.s32.totalorder (!%p1642_p0), %s2170_s16, 0 }
   0x3   : > { %109 = sbr.rel (%p1642_p0) target bundleno = 1163 (0x48b), region = 36  ;;  %p126_p1 = scmp.lt.s32.totalorder (!%p1642_p0), %s1643_s17, 31 }
   0x8   : > { %s3339_s17 = smov (!%p126_p1, %s1643_s17), 31  ;;  %135 = sbr.rel (%p1646_p2) target bundleno = 16 (0x10), region = 40 }
   0x9   : > { %s1705_s18 = sshll.u32 %s3339_s17, 4 }
   0xa   : > { %s2177_s21 = scalar_lea.vmem %s3333_s0, %s1705_s18 }
   0xd   : > { %v2137_v0 = vmov 0.0  }
   0xe   : > { %136 = vst [vmem:[#allocation3] sm:$0x1] %v2137_v0 }
   0xf   : > { %137 = vst [vmem:[#allocation4] sm:$0x1] %v2137_v0 }
  0x10 PF: > { %v185_v1 = vld [vmem:[%s3334_s1 + $0x78] sm:$0xff]  ;;  %vm241_vm0 = vcmask 1044480   ;;  %v184_v3 = vld [vmem:[%s3334_s1 + $0x70] sm:$0xff]  ;;  %v183_v5 = vld [vmem:[%s3334_s1 + $0x68] sm:$0xff]  ;;  %vm192_vm1 = vcmask 236544   ;;  %s1664_s17 = sshll.u32 %s2170_s16, 7 }
  0x11   : > { %v2186_v2 = vld [vmem:[%s3334_s1 + $0x98] sm:$0x1f]  ;;  %245 = vmatpush.msra.mxu0 %v185_v1  ;;  %1706 = vmatpush.msra.mxu2 %v185_v1  ;;  %v2194_v4 = vld [vmem:[%s3334_s1 + $0x90] sm:$0xff]  ;;  %v2204_v6 = vld [vmem:[%s3334_s1 + $0x88] sm:$0xff]  ;;  %s2313_s18 = scalar_lea.vmem [#allocation2], %s1664_s17  ;;  %p1665_p3 = scmp.ne.s32.totalorder %s2170_s16, 1 }
  0x12   : > { %1707 = vmatpush.msra.mxu3 %v185_v1  ;;  %1647 = vmatpush.msk.msra.mxu1 %vm241_vm0, %v2186_v2  ;;  %v182_v7 = vld [vmem:[%s3334_s1 + $0x60] sm:$0xff]  ;;  %v139_v9 = vld [vmem:[%s2177_s21 + $0x8] sm:$0xff]  ;;  %v181_v10 = vld [vmem:[%s3334_s1 + $0x58] sm:$0xff]  ;;  %s2371_s22 = smov (!%p1665_p3), 0  }
  0x13   : > { %246 = vmatpush.msra.mxu0 %v184_v3  ;;  %1708 = vmatpush.msra.mxu2 %v184_v3  ;;  %v2213_v8 = vld [vmem:[%s3334_s1 + $0x80] sm:$0xff]  ;;  %v180_v11 = vld [vmem:[%s3334_s1 + $0x50] sm:$0xff]  ;;  %v179_v12 = vld [vmem:[%s3334_s1 + $0x48] sm:$0xff] }
  0x14   : > { %1709 = vmatpush.msra.mxu3 %v184_v3  ;;  %323 = vmatpush.msra.mxu1 %v2194_v4  ;;  %v178_v13 = vld [vmem:[%s3334_s1 + $0x40] sm:$0xff]  ;;  %v141_v14 = vld [vmem:[%s2177_s21 + $0x18] sm:$0xff]  ;;  %v176_v16 = vld [vmem:[%s3334_s1 + $0x30] sm:$0xff] }
  0x15   : > { %247 = vmatpush.msra.mxu0 %v183_v5  ;;  %1710 = vmatpush.msra.mxu2 %v183_v5  ;;  %v177_v15 = vld [vmem:[%s3334_s1 + $0x38] sm:$0xff]  ;;  %v175_v17 = vld [vmem:[%s3334_s1 + $0x28] sm:$0xff]  ;;  %v174_v18 = vld [vmem:[%s3334_s1 + $0x20] sm:$0xff] }
  0x16   : > { %1711 = vmatpush.msra.mxu3 %v183_v5  ;;  %324 = vmatpush.msra.mxu1 %v2204_v6  ;;  %v143_v19 = vld [vmem:[%s2177_s21 + $0x28] sm:$0xff]  ;;  %v173_v20 = vld [vmem:[%s3334_s1 + $0x18] sm:$0xff]  ;;  %v172_v21 = vld [vmem:[%s3334_s1 + $0x10] sm:$0xff] }
  0x17   : > { %248 = vmatpush.msra.mxu0 %v182_v7  ;;  %1712 = vmatpush.msra.mxu2 %v182_v7  ;;  %v171_v22 = vld [vmem:[%s3334_s1 + $0x8] sm:$0xff]  ;;  %v170_v23 = vld [vmem:[%s3334_s1] sm:$0xff]  ;;  %v152_v25 = vld [vmem:[%s2177_s21 + $0x70] sm:$0xff] }
  0x18   : > { %1713 = vmatpush.msra.mxu3 %v182_v7  ;;  %325 = vmatpush.msra.mxu1 %v2213_v8  ;;  %v138_v24 = vld [vmem:[%s2177_s21] sm:$0xff]  ;;  %v168_v26 = vld [vmem:[%s2177_s21 + $0xf0] sm:$0xff]  ;;  %v145_v27 = vld [vmem:[%s2177_s21 + $0x38] sm:$0xff] }
  0x19   : > { %1648 = vmatmul.msk.f32.vlgmr.msra.gmra.mxu1 %vm192_vm1, %v139_v9  ;;  %249 = vmatpush.msra.mxu0 %v181_v10  ;;  %v140_v28 = vld [vmem:[%s2177_s21 + $0x10] sm:$0xff]  ;;  %v154_v29 = vld [vmem:[%s2177_s21 + $0x80] sm:$0xff]  ;;  %v147_v30 = vld [vmem:[%s2177_s21 + $0x48] sm:$0xff] }
  0x1a   : > { %1714 = vmatpush.msra.mxu2 %v181_v10  ;;  %1715 = vmatpush.msra.mxu3 %v181_v10  ;;  %v159_v31 = vld [vmem:[%s2177_s21 + $0xa8] sm:$0xff]  ;;  %v142_v32 = vld [vmem:[%s2177_s21 + $0x20] sm:$0xff]  ;;  %v156_v33 = vld [vmem:[%s2177_s21 + $0x90] sm:$0xff] }
  0x1b   : > { %250 = vmatpush.msra.mxu0 %v180_v11  ;;  %v149_v34 = vld [vmem:[%s2177_s21 + $0x58] sm:$0xff]  ;;  %v144_v36 = vld [vmem:[%s2177_s21 + $0x30] sm:$0xff]  ;;  %v158_v37 = vld [vmem:[%s2177_s21 + $0xa0] sm:$0xff] }
  0x1c   : > { %1716 = vmatpush.msra.mxu2 %v180_v11  ;;  %1717 = vmatpush.msra.mxu3 %v180_v11  ;;  %v161_v35 = vld [vmem:[%s2177_s21 + $0xb8] sm:$0xff]  ;;  %v151_v38 = vld [vmem:[%s2177_s21 + $0x68] sm:$0xff]  ;;  %v146_v40 = vld [vmem:[%s2177_s21 + $0x40] sm:$0xff] }
  0x1d   : > { %251 = vmatpush.msra.mxu0 %v179_v12  ;;  %v163_v39 = vld [vmem:[%s2177_s21 + $0xc8] sm:$0xff]  ;;  %v160_v41 = vld [vmem:[%s2177_s21 + $0xb0] sm:$0xff]  ;;  %v153_v42 = vld [vmem:[%s2177_s21 + $0x78] sm:$0xff] }
  0x1e   : > { %1718 = vmatpush.msra.mxu2 %v179_v12  ;;  %1719 = vmatpush.msra.mxu3 %v179_v12  ;;  %v165_v43 = vld [vmem:[%s2177_s21 + $0xd8] sm:$0xff]  ;;  %v148_v44 = vld [vmem:[%s2177_s21 + $0x50] sm:$0xff]  ;;  %v162_v45 = vld [vmem:[%s2177_s21 + $0xc0] sm:$0xff] }
  0x1f   : > { %252 = vmatpush.msra.mxu0 %v178_v13  ;;  %v155_v46 = vld [vmem:[%s2177_s21 + $0x88] sm:$0xff]  ;;  %v150_v48 = vld [vmem:[%s2177_s21 + $0x60] sm:$0xff]  ;;  %v164_v49 = vld [vmem:[%s2177_s21 + $0xd0] sm:$0xff] }
  0x20   : > { %1720 = vmatpush.msra.mxu2 %v178_v13  ;;  %1721 = vmatpush.msra.mxu3 %v178_v13  ;;  %v167_v47 = vld [vmem:[%s2177_s21 + $0xe8] sm:$0xff]  ;;  %v157_v50 = vld [vmem:[%s2177_s21 + $0x98] sm:$0xff]  ;;  %v166_v52 = vld [vmem:[%s2177_s21 + $0xe0] sm:$0xff] }
  0x21   : > { %1649 = vmatmul.msk.f32.gmra.mxu1 %vm192_vm1, %v141_v14  ;;  %253 = vmatpush.msra.mxu0 %v177_v15  ;;  %v169_v51 = vld [vmem:[%s2177_s21 + $0xf8] sm:$0xff]  ;;  %v2309_v56 = vld [vmem:[%s3336_s3] ss:$0 sm:$0xff] }
  0x22   : > { %1722 = vmatpush.msra.mxu2 %v177_v15  ;;  %1723 = vmatpush.msra.mxu3 %v177_v15 }
  0x23   : > { %254 = vmatpush.msra.mxu0 %v176_v16 }
  0x24   : > { %1724 = vmatpush.msra.mxu2 %v176_v16  ;;  %1725 = vmatpush.msra.mxu3 %v176_v16 }
  0x25   : > { %255 = vmatpush.msra.mxu0 %v175_v17 }
  0x26   : > { %1726 = vmatpush.msra.mxu2 %v175_v17  ;;  %1727 = vmatpush.msra.mxu3 %v175_v17 }
  0x27   : > { %256 = vmatpush.msra.mxu0 %v174_v18 }
  0x28   : > { %1728 = vmatpush.msra.mxu2 %v174_v18  ;;  %1729 = vmatpush.msra.mxu3 %v174_v18 }
  0x29   : > { %1650 = vmatmul.msk.f32.gmra.mxu1 %vm192_vm1, %v143_v19  ;;  %257 = vmatpush.msra.mxu0 %v173_v20 }
  0x2a   : > { %1730 = vmatpush.msra.mxu2 %v173_v20  ;;  %1731 = vmatpush.msra.mxu3 %v173_v20 }
  0x2b   : > { %258 = vmatpush.msra.mxu0 %v172_v21 }
  0x2c   : > { %1732 = vmatpush.msra.mxu2 %v172_v21  ;;  %1733 = vmatpush.msra.mxu3 %v172_v21 }
  0x2d   : > { %259 = vmatpush.msra.mxu0 %v171_v22 }
  0x2e   : > { %1734 = vmatpush.msra.mxu2 %v171_v22  ;;  %1735 = vmatpush.msra.mxu3 %v171_v22 }
  0x2f   : > { %260 = vmatpush.msra.mxu0 %v170_v23 }
  0x30   : > { %1736 = vmatpush.msra.mxu2 %v170_v23  ;;  %1737 = vmatpush.msra.mxu3 %v170_v23 }
  0x31   : > { %261 = vmatmul.f32.vlgmr.msra.gmra.mxu0 %v138_v24  ;;  %282 = vmatmul.f32.vlgmr.msra.gmra.mxu2 %v152_v25 }
  0x32   : > { %306 = vmatmul.f32.vlgmr.msra.gmra.mxu3 %v168_v26  ;;  %1651 = vmatmul.msk.f32.gmra.mxu1 %vm192_vm1, %v145_v27 }
  0x33   : > { %1738 = vmatpush.msk.msrb.mxu3 %vm241_vm0, %v2186_v2 }
  0x35   : > { %1739 = vmatpush.msrb.mxu3 %v2194_v4 }
  0x37   : > { %1740 = vmatpush.msrb.mxu3 %v2204_v6 }
  0x39   : > { %1741 = vmatpush.msrb.mxu3 %v2213_v8  ;;  %264 = vmatmul.f32.gmra.mxu0 %v140_v28 }
  0x3a   : > { %285 = vmatmul.f32.gmra.mxu2 %v154_v29  ;;  %1652 = vmatmul.msk.f32.gmra.mxu1 %vm192_vm1, %v147_v30 }
  0x3b   : > { %1658 = vmatmul.msk.f32.vlgmr.msrb.gmra.mxu3 %vm192_vm1, %v159_v31 }
  0x41   : > { %267 = vmatmul.f32.gmra.mxu0 %v142_v32 }
  0x42   : > { %288 = vmatmul.f32.gmra.mxu2 %v156_v33  ;;  %1653 = vmatmul.msk.f32.gmra.mxu1 %vm192_vm1, %v149_v34 }
  0x43   : > { %1659 = vmatmul.msk.f32.gmra.mxu3 %vm192_vm1, %v161_v35 }
  0x49   : > { %270 = vmatmul.f32.gmra.mxu0 %v144_v36 }
  0x4a   : > { %291 = vmatmul.f32.gmra.mxu2 %v158_v37  ;;  %1654 = vmatmul.msk.f32.gmra.mxu1 %vm192_vm1, %v151_v38 }
  0x4b   : > { %1660 = vmatmul.msk.f32.gmra.mxu3 %vm192_vm1, %v163_v39 }
  0x51   : > { %273 = vmatmul.f32.gmra.mxu0 %v146_v40 }
  0x52   : > { %294 = vmatmul.f32.gmra.mxu2 %v160_v41  ;;  %1655 = vmatmul.msk.f32.gmra.mxu1 %vm192_vm1, %v153_v42 }
  0x53   : > { %1661 = vmatmul.msk.f32.gmra.mxu3 %vm192_vm1, %v165_v43 }
  0x59   : > { %276 = vmatmul.f32.gmra.mxu0 %v148_v44 }
  0x5a   : > { %297 = vmatmul.f32.gmra.mxu2 %v162_v45  ;;  %1656 = vmatmul.msk.f32.gmra.mxu1 %vm192_vm1, %v155_v46 }
  0x5b   : > { %1662 = vmatmul.msk.f32.gmra.mxu3 %vm192_vm1, %v167_v47 }
  0x61   : > { %279 = vmatmul.f32.gmra.mxu0 %v150_v48 }
  0x62   : > { %300 = vmatmul.f32.gmra.mxu2 %v164_v49  ;;  %1657 = vmatmul.msk.f32.gmra.mxu1 %vm192_vm1, %v157_v50 }
  0x63   : > { %1663 = vmatmul.msk.f32.gmra.mxu3 %vm192_vm1, %v169_v51 }
  0x6a   : > { %303 = vmatmul.f32.gmra.mxu2 %v166_v52 }
  0x96   : > { %v327_v53 = vpop.f32.mrf.mxu1 }
  0x9e   : > { %v330_v54 = vpop.f32.mrf.mxu1 }
  0xa6   : > { %v333_v55 = vpop.f32.mrf.mxu1 }
  0xae   : > { %v262_v57 = vpop.f32.mrf.mxu0 }
  0xaf   : > { %v263_v58 = vadd.f32 %v2309_v56, %v262_v57  ;;  %v336_v59 = vpop.f32.mrf.mxu1 }
  0xb1   : > { %v328_v60 = vadd.f32 %v327_v53, %v263_v58 }
  0xb3   : > { %377 = vst [vmem:[%s2313_s18] sm:$0xff] %v328_v60  ;;  %v418_v35 = vmul.f32 %v328_v60, %v328_v60 }
  0xb4   : > { %v283_v61 = vpop.f32.mrf.mxu2 }
  0xb5   : > { %v2316_v62 = vpop.f32.mrf.mxu3  ;;  %v284_v16 = vadd.f32 %v2309_v56, %v283_v61 }
  0xb6   : > { %v265_v63 = vpop.f32.mrf.mxu0 }
  0xb7   : > { %v266_v0 = vadd.f32 %v2309_v56, %v265_v63  ;;  %v339_v1 = vpop.f32.mrf.mxu1 }
  0xb9   : > { %v331_v2 = vadd.f32 %v330_v54, %v266_v0 }
  0xbb   : > { %378 = vst [vmem:[%s2313_s18 + $0x8] sm:$0xff] %v331_v2  ;;  %v419_v30 = vmul.f32 %v331_v2, %v331_v2  ;;  %v394_v36 = vadd.f32 %v331_v2, %v328_v60 }
  0xbd   : > { %v286_v3 = vpop.f32.mrf.mxu2  ;;  %v434_v39 = vadd.f32 %v419_v30, %v418_v35 }
  0xbe   : > { %v357_v4 = vpop.f32.mrf.mxu3  ;;  %v268_v5 = vpop.f32.mrf.mxu0  ;;  %v287_v26 = vadd.f32 %v2309_v56, %v286_v3 }
  0xbf   : > { %v269_v6 = vadd.f32 %v2309_v56, %v268_v5  ;;  %v342_v7 = vpop.f32.mrf.mxu1 }
  0xc1   : > { %v334_v8 = vadd.f32 %v333_v55, %v269_v6 }
  0xc3   : > { %379 = vst [vmem:[%s2313_s18 + $0x10] sm:$0xff] %v334_v8  ;;  %v420_v37 = vmul.f32 %v334_v8, %v334_v8  ;;  %v395_v40 = vadd.f32 %v394_v36, %v334_v8 }
  0xc5   : > { %v289_v9 = vpop.f32.mrf.mxu2  ;;  %v435_v42 = vadd.f32 %v434_v39, %v420_v37 }
  0xc6   : > { %v360_v10 = vpop.f32.mrf.mxu3  ;;  %v271_v11 = vpop.f32.mrf.mxu0  ;;  %v290_v46 = vadd.f32 %v2309_v56, %v289_v9 }
  0xc7   : > { %v272_v12 = vadd.f32 %v2309_v56, %v271_v11  ;;  %v345_v13 = vpop.f32.mrf.mxu1 }
  0xc9   : > { %v337_v14 = vadd.f32 %v336_v59, %v272_v12 }
  0xcb   : > { %380 = vst [vmem:[%s2313_s18 + $0x18] sm:$0xff] %v337_v14  ;;  %v421_v41 = vmul.f32 %v337_v14, %v337_v14  ;;  %v396_v43 = vadd.f32 %v395_v40, %v337_v14 }
  0xcd   : > { %v292_v15 = vpop.f32.mrf.mxu2  ;;  %v436_v50 = vadd.f32 %v435_v42, %v421_v41 }
  0xce   : > { %v293_v17 = vadd.f32 %v2309_v56, %v292_v15  ;;  %v363_v18 = vpop.f32.mrf.mxu3  ;;  %v274_v19 = vpop.f32.mrf.mxu0 }
  0xcf   : > { %v275_v20 = vadd.f32 %v2309_v56, %v274_v19  ;;  %v348_v21 = vpop.f32.mrf.mxu1 }
  0xd0   : > { %v2327_v22 = vadd.f32 %v357_v4, %v293_v17  ;;  %v349_v23 = vadd.f32 %v348_v21, %v284_v16 }
  0xd1   : > { %v340_v24 = vadd.f32 %v339_v1, %v275_v20  ;;  %v308_v1 = vadd.f32 %v2309_v56, %v2316_v62 }
  0xd2   : > { %387 = vst [vmem:[%s2313_s18 + $0x50] sm:$0xff] %v2327_v22  ;;  %v425_v2 = vmul.f32 %v349_v23, %v349_v23  ;;  %v428_v62 = vmul.f32 %v2327_v22, %v2327_v22 }
  0xd3   : > { %381 = vst [vmem:[%s2313_s18 + $0x20] sm:$0xff] %v340_v24  ;;  %v422_v44 = vmul.f32 %v340_v24, %v340_v24  ;;  %v397_v51 = vadd.f32 %v396_v43, %v340_v24 }
  0xd4   : > { %384 = vst [vmem:[%s2313_s18 + $0x38] sm:$0xff] %v349_v23 }
  0xd5   : > { %v295_v25 = vpop.f32.mrf.mxu2  ;;  %v437_v58 = vadd.f32 %v436_v50, %v422_v44 }
  0xd6   : > { %v296_v27 = vadd.f32 %v2309_v56, %v295_v25  ;;  %v366_v28 = vpop.f32.mrf.mxu3  ;;  %v277_v29 = vpop.f32.mrf.mxu0 }
  0xd7   : > { %v278_v31 = vadd.f32 %v2309_v56, %v277_v29  ;;  %v351_v32 = vpop.f32.mrf.mxu1 }
  0xd8   : > { %v361_v33 = vadd.f32 %v360_v10, %v296_v27  ;;  %v352_v34 = vadd.f32 %v351_v32, %v287_v26 }
  0xd9   : > { %v343_v38 = vadd.f32 %v342_v7, %v278_v31 }
  0xda   : > { %388 = vst [vmem:[%s2313_s18 + $0x58] sm:$0xff] %v361_v33  ;;  %v426_v8 = vmul.f32 %v352_v34, %v352_v34 }
  0xdb   : > { %382 = vst [vmem:[%s2313_s18 + $0x28] sm:$0xff] %v343_v38  ;;  %v423_v52 = vmul.f32 %v343_v38, %v343_v38  ;;  %v398_v59 = vadd.f32 %v397_v51, %v343_v38 }
  0xdc   : > { %385 = vst [vmem:[%s2313_s18 + $0x40] sm:$0xff] %v352_v34 }
  0xdd   : > { %v298_v45 = vpop.f32.mrf.mxu2  ;;  %v438_v61 = vadd.f32 %v437_v58, %v423_v52 }
  0xde   : > { %v299_v47 = vadd.f32 %v2309_v56, %v298_v45  ;;  %v369_v48 = vpop.f32.mrf.mxu3  ;;  %v280_v49 = vpop.f32.mrf.mxu0  ;;  %v393_v45 = vld [vmem:[#allocation3] sm:$0x1] }
  0xdf   : > { %v281_v53 = vadd.f32 %v2309_v56, %v280_v49  ;;  %v354_v54 = vpop.f32.mrf.mxu1 }
  0xe0   : > { %v364_v55 = vadd.f32 %v363_v18, %v299_v47  ;;  %v355_v57 = vadd.f32 %v354_v54, %v290_v46  ;;  %v429_v18 = vmul.f32 %v361_v33, %v361_v33 }
  0xe1   : > { %v346_v60 = vadd.f32 %v345_v13, %v281_v53 }
  0xe2   : > { %389 = vst [vmem:[%s2313_s18 + $0x60] sm:$0xff] %v364_v55  ;;  %v427_v14 = vmul.f32 %v355_v57, %v355_v57  ;;  %v430_v24 = vmul.f32 %v364_v55, %v364_v55 }
  0xe3   : > { %383 = vst [vmem:[%s2313_s18 + $0x30] sm:$0xff] %v346_v60  ;;  %v399_v63 = vadd.f32 %v398_v59, %v346_v60  ;;  %v424_v0 = vmul.f32 %v346_v60, %v346_v60 }
  0xe4   : > { %386 = vst [vmem:[%s2313_s18 + $0x48] sm:$0xff] %v355_v57 }
  0xe5   : > { %v439_v3 = vadd.f32 %v438_v61, %v424_v0  ;;  %v400_v4 = vadd.f32 %v399_v63, %v349_v23  ;;  %v301_v5 = vpop.f32.mrf.mxu2 }
  0xe6   : > { %v302_v6 = vadd.f32 %v2309_v56, %v301_v5  ;;  %v372_v7 = vpop.f32.mrf.mxu3 }
  0xe7   : > { %v401_v9 = vadd.f32 %v400_v4, %v352_v34  ;;  %v440_v10 = vadd.f32 %v439_v3, %v425_v2  ;;  %v373_v11 = vadd.f32 %v372_v7, %v308_v1 }
  0xe8   : > { %v367_v12 = vadd.f32 %v366_v28, %v302_v6 }
  0xe9   : > { %v402_v13 = vadd.f32 %v401_v9, %v355_v57  ;;  %v441_v15 = vadd.f32 %v440_v10, %v426_v8  ;;  %392 = vst [vmem:[%s2313_s18 + $0x78] sm:$0xff] %v373_v11  ;;  %v433_v35 = vmul.f32 %v373_v11, %v373_v11 }
  0xea   : > { %390 = vst [vmem:[%s2313_s18 + $0x68] sm:$0xff] %v367_v12  ;;  %v431_v29 = vmul.f32 %v367_v12, %v367_v12 }
  0xeb   : > { %v403_v16 = vadd.f32 %v402_v13, %v2327_v22  ;;  %v442_v17 = vadd.f32 %v441_v15, %v427_v14 }
  0xed   : > { %v404_v19 = vadd.f32 %v403_v16, %v361_v33  ;;  %v443_v20 = vadd.f32 %v442_v17, %v428_v62  ;;  %v304_v21 = vpop.f32.mrf.mxu2 }
  0xee   : > { %v305_v23 = vadd.f32 %v2309_v56, %v304_v21 }
  0xef   : > { %v444_v25 = vadd.f32 %v443_v20, %v429_v18  ;;  %v405_v26 = vadd.f32 %v404_v19, %v364_v55 }
  0xf0   : > { %v370_v27 = vadd.f32 %v369_v48, %v305_v23  ;;  %v417_v48 = vld [vmem:[#allocation4] sm:$0x1] }
  0xf1   : > { %v406_v28 = vadd.f32 %v405_v26, %v367_v12  ;;  %v445_v30 = vadd.f32 %v444_v25, %v430_v24 }
  0xf2   : > { %391 = vst [vmem:[%s2313_s18 + $0x70] sm:$0xff] %v370_v27  ;;  %v432_v34 = vmul.f32 %v370_v27, %v370_v27 }
  0xf3   : > { %v446_v31 = vadd.f32 %v445_v30, %v431_v29  ;;  %v407_v32 = vadd.f32 %v406_v28, %v370_v27 }
  0xf5   : > { %v408_v22 = vadd.f32 %v407_v32, %v373_v11  ;;  %v447_v36 = vadd.f32 %v446_v31, %v432_v34 }
  0xf7   : > { %v409_v37 = vrot.slane %v408_v22, 4  ;;  %v448_v33 = vadd.f32 %v447_v36, %v433_v35 }
  0xf9   : > { %v410_v38 = vadd.f32 %v409_v37, %v408_v22  ;;  %v449_v39 = vrot.slane %v448_v33, 4 }
  0xfb   : > { %v411_v40 = vrot.slane %v410_v38, 2  ;;  %v450_v56 = vadd.f32 %v449_v39, %v448_v33 }
  0xfd   : > { %v412_v41 = vadd.f32 %v411_v40, %v410_v38  ;;  %v451_v42 = vrot.slane %v450_v56, 2 }
  0xff   : > { %v413_v43 = vrot.slane %v412_v41, 1  ;;  %v452_v44 = vadd.f32 %v451_v42, %v450_v56 }
 0x101   : > { %v414_v46 = vadd.f32 %v413_v43, %v412_v41  ;;  %v453_v47 = vrot.slane %v452_v44, 1 }
 0x103   : > { %v415_v49 = vadd.f32 %v414_v46, %v393_v45  ;;  %v454_v50 = vadd.f32 %v453_v47, %v452_v44  ;;  %460 = sbr.rel (%p1665_p3) target bundleno = 1163 (0x48b), region = 44 }
 0x105   : > { %416 = vst [vmem:[#allocation3] sm:$0x1] %v415_v49  ;;  %v455_v51 = vadd.f32 %v454_v50, %v417_v48 }
 0x107   : > { %456 = vst [vmem:[#allocation4] sm:$0x1] %v455_v51 }
 0x108   : > { %v467_v3 = vld [vmem:[%s3336_s3 + $0x1] sm:$0x1]  ;;  %v2364_v7 = vld [vmem:[%s3336_s3 + $0x2] sm:$0x1] }
 0x10c   : > { %v461_v52 = vld [vmem:[#allocation3] sm:$0x1] }
 0x10d   : > { %v462_v54 = vmul.f32 0.00390625, %v461_v52 }
 0x10e   : > { %v463_v53 = vld [vmem:[#allocation4] sm:$0x1] }
 0x10f   : > { %v464_v55 = vmul.f32 0.00390625, %v463_v53  ;;  %v465_v57 = vmul.f32 %v462_v54, %v462_v54 }
 0x111   : > { %v466_v58 = vsub.f32 %v464_v55, %v465_v57 }
 0x113   : > { %v469_v59 = vmax.f32 %v466_v58, 0.0 }
 0x115   : > { %v470_v60 = vadd.f32 1e-05, %v469_v59 }
 0x117   : > { %1945 = vrsqrt.f32 %v470_v60  ;;  %vm477_vm2 = vweird.f32 %v470_v60 }
 0x11d   : > { %v1946_v61 = vpop.eup %1945 }
 0x11e   : > { %v472_v63 = vmul.f32 %v1946_v61, %v470_v60  ;;  %vm478_vm3 = vweird.f32 %v1946_v61 }
 0x11f   : > { %vm479_vm4 = vmor %vm477_vm2, %vm478_vm3 }
 0x120   : > { %v473_v0 = vmul.f32 %v1946_v61, %v472_v63 }
 0x122   : > { %v474_v1 = vmul.f32 0.5, %v473_v0 }
 0x124   : > { %v475_v2 = vsub.f32 1.5, %v474_v1 }
 0x126   : > { %v476_v4 = vmul.f32 %v1946_v61, %v475_v2 }
 0x128   : > { %v480_v5 = vsel %vm479_vm4, %v1946_v61, %v476_v4 }
 0x129   : > { %v2359_v6 = vmul.f32 %v480_v5, %v467_v3 }
 0x12b   : > { %v2367_v8 = vmul.f32 %v2359_v6, %v462_v54 }
 0x12d   : > { %v483_v9 = vsub.f32 %v2364_v7, %v2367_v8 }
 0x12e LB: >> { %v2377_v10 = vperm.slane %v2359_v6, 0  ;;  %s1666_s23 = sshll.u32 %s2115_s22, 7  ;;  %s489_s22 = sadd.s32 1, %s2115_s22   ;;  %s2115_s22 = sphi %s2371_s22, %s489_s22  }
 0x12f   : >> { %v2383_v11 = vperm.slane %v483_v9, 0  ;;  %s2385_s24 = scalar_lea.vmem [#allocation2], %s1666_s23  ;;  %p486_p4 = scmp.ge.s32.totalorder %s489_s22, 2  }
 0x130   : >> { %v492_v12 = vld [vmem:[%s2385_s24] sm:$0xff]  ;;  %v493_v13 = vld [vmem:[%s2385_s24 + $0x8] sm:$0xff]  ;;  %v494_v14 = vld [vmem:[%s2385_s24 + $0x10] sm:$0xff]  ;;  %s2551_s12 = smov (%p486_p4), 0  }
 0x131   : >> { %v509_v15 = vmul.f32 %v2377_v10, %v492_v12  ;;  %v510_v62 = vmul.f32 %v2377_v10, %v493_v13  ;;  %v511_v16 = vmul.f32 %v2377_v10, %v494_v14  ;;  %v495_v17 = vld [vmem:[%s2385_s24 + $0x18] sm:$0xff]  ;;  %v496_v18 = vld [vmem:[%s2385_s24 + $0x20] sm:$0xff]  ;;  %v497_v19 = vld [vmem:[%s2385_s24 + $0x28] sm:$0xff] }
 0x132   : >> { %v512_v20 = vmul.f32 %v2377_v10, %v495_v17  ;;  %v513_v21 = vmul.f32 %v2377_v10, %v496_v18  ;;  %v514_v23 = vmul.f32 %v2377_v10, %v497_v19  ;;  %v498_v24 = vld [vmem:[%s2385_s24 + $0x30] sm:$0xff]  ;;  %v499_v25 = vld [vmem:[%s2385_s24 + $0x38] sm:$0xff]  ;;  %v500_v35 = vld [vmem:[%s2385_s24 + $0x40] sm:$0xff] }
 0x133   : >> { %v526_v26 = vadd.f32 %v2383_v11, %v509_v15  ;;  %v527_v27 = vadd.f32 %v2383_v11, %v510_v62  ;;  %v528_v28 = vadd.f32 %v2383_v11, %v511_v16  ;;  %v515_v29 = vmul.f32 %v2377_v10, %v498_v24  ;;  %v501_v22 = vld [vmem:[%s2385_s24 + $0x48] sm:$0xff]  ;;  %v502_v39 = vld [vmem:[%s2385_s24 + $0x50] sm:$0xff]  ;;  %v503_v40 = vld [vmem:[%s2385_s24 + $0x58] sm:$0xff] }
 0x134   : >> { %v529_v30 = vadd.f32 %v2383_v11, %v512_v20  ;;  %v530_v31 = vadd.f32 %v2383_v11, %v513_v21  ;;  %v531_v32 = vadd.f32 %v2383_v11, %v514_v23  ;;  %v516_v34 = vmul.f32 %v2377_v10, %v499_v25  ;;  %v504_v44 = vld [vmem:[%s2385_s24 + $0x60] sm:$0xff]  ;;  %v505_v48 = vld [vmem:[%s2385_s24 + $0x68] sm:$0xff]  ;;  %v506_v59 = vld [vmem:[%s2385_s24 + $0x70] sm:$0xff] }
 0x135   : >> { %v542_v36 = vmul.f32 0.5, %v526_v26  ;;  %v543_v37 = vmul.f32 0.5, %v527_v27  ;;  %v544_v33 = vmul.f32 0.5, %v528_v28  ;;  %v532_v38 = vadd.f32 %v2383_v11, %v515_v29  ;;  %v507_v60 = vld [vmem:[%s2385_s24 + $0x78] sm:$0xff]  ;;  %v2477_v6 = vld [vmem:[%s3335_s2 + $0x8] sm:$0xff] (%p486_p4)  ;;  %v2482_v7 = vld [vmem:[%s3335_s2 + $0x10] sm:$0xff] (%p486_p4) }
 0x136   : >> { %v545_v56 = vmul.f32 0.5, %v529_v30  ;;  %v546_v41 = vmul.f32 0.5, %v530_v31  ;;  %v547_v42 = vmul.f32 0.5, %v531_v32  ;;  %v533_v43 = vadd.f32 %v2383_v11, %v516_v34  ;;  %v2487_v8 = vld [vmem:[%s3335_s2 + $0x18] sm:$0xff] (%p486_p4)  ;;  %v2492_v9 = vld [vmem:[%s3335_s2 + $0x20] sm:$0xff] (%p486_p4) }
 0x137   : >> { %1947 = vtanh.f32 %v542_v36  ;;  %v548_v45 = vmul.f32 0.5, %v532_v38  ;;  %v517_v46 = vmul.f32 %v2377_v10, %v500_v35  ;;  %v518_v47 = vmul.f32 %v2377_v10, %v501_v22 }
 0x138   : >> { %1949 = vtanh.f32 %v543_v37  ;;  %v549_v49 = vmul.f32 0.5, %v533_v43  ;;  %v519_v50 = vmul.f32 %v2377_v10, %v502_v39  ;;  %v520_v51 = vmul.f32 %v2377_v10, %v503_v40 }
 0x139   : >> { %1951 = vtanh.f32 %v544_v33  ;;  %v534_v52 = vadd.f32 %v2383_v11, %v517_v46  ;;  %v535_v53 = vadd.f32 %v2383_v11, %v518_v47  ;;  %v521_v54 = vmul.f32 %v2377_v10, %v504_v44 }
 0x13a   : >> { %1953 = vtanh.f32 %v545_v56  ;;  %v536_v55 = vadd.f32 %v2383_v11, %v519_v50  ;;  %v537_v57 = vadd.f32 %v2383_v11, %v520_v51  ;;  %v522_v58 = vmul.f32 %v2377_v10, %v505_v48 }
 0x13b   : >> { %1955 = vtanh.f32 %v546_v41  ;;  %v550_v61 = vmul.f32 0.5, %v534_v52  ;;  %v538_v63 = vadd.f32 %v2383_v11, %v521_v54  ;;  %v551_v0 = vmul.f32 0.5, %v535_v53 }
 0x13c   : >> { %1957 = vtanh.f32 %v547_v42  ;;  %v539_v1 = vadd.f32 %v2383_v11, %v522_v58  ;;  %v552_v3 = vmul.f32 0.5, %v536_v55  ;;  %v523_v4 = vmul.f32 %v2377_v10, %v506_v59 }
 0x13d   : >> { %v1948_v2 = vpop.eup %1947  ;;  %1959 = vtanh.f32 %v548_v45  ;;  %v524_v5 = vmul.f32 %v2377_v10, %v507_v60  ;;  %v553_v14 = vmul.f32 0.5, %v537_v57  ;;  %v554_v15 = vmul.f32 0.5, %v538_v63 }
 0x13e   : >> { %v1950_v12 = vpop.eup %1949  ;;  %v574_v13 = vadd.f32 1.0, %v1948_v2  ;;  %1961 = vtanh.f32 %v549_v49  ;;  %v540_v17 = vadd.f32 %v2383_v11, %v523_v4  ;;  %v555_v23 = vmul.f32 0.5, %v539_v1  ;;  %v2462_v1 = vld [vmem:[%s3336_s3 + $0x4] sm:$0x1] (%p486_p4)  ;;  %v2467_v2 = vld [vmem:[%s3336_s3 + $0x5] sm:$0x1] (%p486_p4) }
 0x13f   : >> { %v1952_v62 = vpop.eup %1951  ;;  %v575_v16 = vadd.f32 1.0, %v1950_v12  ;;  %1963 = vtanh.f32 %v550_v61  ;;  %v541_v18 = vadd.f32 %v2383_v11, %v524_v5  ;;  %v2497_v4 = vld [vmem:[%s3335_s2 + $0x28] sm:$0xff] (%p486_p4)  ;;  %v2138_v5 = vmov (%p486_p4), 0.0   ;;  %v2503_v12 = vld [vmem:[%s3335_s2 + $0x30] sm:$0xff] (%p486_p4) }
 0x140   : >> { %v1954_v19 = vpop.eup %1953  ;;  %v590_v20 = vmul.f32 0.5, %v574_v13  ;;  %v576_v21 = vadd.f32 1.0, %v1952_v62  ;;  %1965 = vtanh.f32 %v551_v0  ;;  %v556_v26 = vmul.f32 0.5, %v540_v17  ;;  %v2457_v0 = vld [vmem:[%s3336_s3 + $0x3] sm:$0x1] (%p486_p4)  ;;  %v2508_v13 = vld [vmem:[%s3335_s2 + $0x38] sm:$0xff] (%p486_p4) }
 0x141   : >> { %v1956_v10 = vpop.eup %1955  ;;  %v591_v24 = vmul.f32 0.5, %v575_v16  ;;  %v577_v25 = vadd.f32 1.0, %v1954_v19  ;;  %1967 = vtanh.f32 %v552_v3  ;;  %v557_v30 = vmul.f32 0.5, %v541_v18  ;;  %v2472_v3 = vld [vmem:[%s3335_s2] sm:$0xff] (%p486_p4)  ;;  %641 = vst [vmem:[#allocation3] sm:$0x1] (%p486_p4), %v2138_v5 }
 0x142   : >> { %v1958_v27 = vpop.eup %1957  ;;  %606 = vst [vmem:[%s2385_s24] sm:$0xff] %v590_v20  ;;  %v592_v28 = vmul.f32 0.5, %v576_v21  ;;  %v578_v29 = vadd.f32 1.0, %v1956_v10  ;;  %1969 = vtanh.f32 %v553_v14  ;;  %v2513_v14 = vld [vmem:[%s3335_s2 + $0x40] sm:$0xff] (%p486_p4)  ;;  %v2524_v62 = vld [vmem:[%s3335_s2 + $0x50] sm:$0xff] (%p486_p4)  ;;  %v2529_v16 = vld [vmem:[%s3335_s2 + $0x58] sm:$0xff] (%p486_p4) }
 0x143   : >> { %v1960_v11 = vpop.eup %1959  ;;  %607 = vst [vmem:[%s2385_s24 + $0x8] sm:$0xff] %v591_v24  ;;  %v593_v31 = vmul.f32 0.5, %v577_v25  ;;  %v579_v32 = vadd.f32 1.0, %v1958_v27  ;;  %1971 = vtanh.f32 %v554_v15  ;;  %v2519_v15 = vld [vmem:[%s3335_s2 + $0x48] sm:$0xff] (%p486_p4)  ;;  %v2534_v17 = vld [vmem:[%s3335_s2 + $0x60] sm:$0xff] (%p486_p4)  ;;  %v2544_v19 = vld [vmem:[%s3335_s2 + $0x70] sm:$0xff] (%p486_p4) }
 0x144   : >> { %v1962_v34 = vpop.eup %1961  ;;  %608 = vst [vmem:[%s2385_s24 + $0x10] sm:$0xff] %v592_v28  ;;  %v594_v35 = vmul.f32 0.5, %v578_v29  ;;  %v580_v22 = vadd.f32 1.0, %v1960_v11  ;;  %1973 = vtanh.f32 %v555_v23  ;;  %v2539_v18 = vld [vmem:[%s3335_s2 + $0x68] sm:$0xff] (%p486_p4)  ;;  %v2549_v20 = vld [vmem:[%s3335_s2 + $0x78] sm:$0xff] (%p486_p4) }
 0x145   : >> { %v1964_v36 = vpop.eup %1963  ;;  %609 = vst [vmem:[%s2385_s24 + $0x18] sm:$0xff] %v593_v31  ;;  %v595_v37 = vmul.f32 0.5, %v579_v32  ;;  %v581_v33 = vadd.f32 1.0, %v1962_v34  ;;  %1975 = vtanh.f32 %v556_v26 }
 0x146   : >> { %v1966_v38 = vpop.eup %1965  ;;  %610 = vst [vmem:[%s2385_s24 + $0x20] sm:$0xff] %v594_v35  ;;  %v596_v39 = vmul.f32 0.5, %v580_v22  ;;  %v582_v40 = vadd.f32 1.0, %v1964_v36  ;;  %1977 = vtanh.f32 %v557_v30 }
 0x147   : >> { %v1968_v56 = vpop.eup %1967  ;;  %611 = vst [vmem:[%s2385_s24 + $0x28] sm:$0xff] %v595_v37  ;;  %v597_v41 = vmul.f32 0.5, %v581_v33  ;;  %v583_v42 = vadd.f32 1.0, %v1966_v38 }
 0x148   : >> { %v1970_v43 = vpop.eup %1969  ;;  %612 = vst [vmem:[%s2385_s24 + $0x30] sm:$0xff] %v596_v39  ;;  %v598_v44 = vmul.f32 0.5, %v582_v40  ;;  %v584_v45 = vadd.f32 1.0, %v1968_v56 }
 0x149   : >> { %v1972_v46 = vpop.eup %1971  ;;  %613 = vst [vmem:[%s2385_s24 + $0x38] sm:$0xff] %v597_v41  ;;  %v599_v47 = vmul.f32 0.5, %v583_v42  ;;  %v585_v48 = vadd.f32 1.0, %v1970_v43 }
 0x14a   : >> { %v1974_v49 = vpop.eup %1973  ;;  %614 = vst [vmem:[%s2385_s24 + $0x40] sm:$0xff] %v598_v44  ;;  %v600_v50 = vmul.f32 0.5, %v584_v45  ;;  %v586_v51 = vadd.f32 1.0, %v1972_v46 }
 0x14b   : >> { %v1976_v52 = vpop.eup %1975  ;;  %615 = vst [vmem:[%s2385_s24 + $0x48] sm:$0xff] %v599_v47  ;;  %v601_v53 = vmul.f32 0.5, %v585_v48  ;;  %v587_v54 = vadd.f32 1.0, %v1974_v49 }
 0x14c   : >> { %v1978_v55 = vpop.eup %1977  ;;  %616 = vst [vmem:[%s2385_s24 + $0x50] sm:$0xff] %v600_v50  ;;  %v602_v57 = vmul.f32 0.5, %v586_v51  ;;  %v588_v58 = vadd.f32 1.0, %v1976_v52 }
 0x14d   : >> { %617 = vst [vmem:[%s2385_s24 + $0x58] sm:$0xff] %v601_v53  ;;  %v603_v59 = vmul.f32 0.5, %v587_v54  ;;  %v589_v60 = vadd.f32 1.0, %v1978_v55  ;;  %488 = sbr.rel (!%p486_p4) target bundleno = 302 (0x12e), region = 133 }
 0x14e   : >> { %618 = vst [vmem:[%s2385_s24 + $0x60] sm:$0xff] %v602_v57  ;;  %v604_v61 = vmul.f32 0.5, %v588_v58 }
 0x14f   : >> { %619 = vst [vmem:[%s2385_s24 + $0x68] sm:$0xff] %v603_v59  ;;  %v605_v63 = vmul.f32 0.5, %v589_v60 }
 0x150   : >> { %620 = vst [vmem:[%s2385_s24 + $0x70] sm:$0xff] %v604_v61 }
 0x151   : >> { %621 = vst [vmem:[%s2385_s24 + $0x78] sm:$0xff] %v605_v63 }
 0x152   : > { %642 = vst [vmem:[#allocation4] sm:$0x1] %v2138_v5 }
 0x153 LB: >> { %668 = vmatpush.msra.mxu0 %v2549_v20  ;;  %1742 = vmatpush.msra.mxu1 %v2549_v20  ;;  %s1667_s13 = sshll.u32 %s2119_s12, 7  ;;  %v2640_v36 = vperm.slane %v2457_v0, 0  ;;  %s648_s12 = sadd.s32 1, %s2119_s12   ;;  %s2119_s12 = sphi %s2551_s12, %s648_s12  }
 0x154   : >> { %1743 = vmatpush.msra.mxu2 %v2549_v20  ;;  %1744 = vmatpush.msra.mxu3 %v2549_v20  ;;  %s2614_s14 = scalar_lea.vmem [#allocation2], %s1667_s13  ;;  %p645_p5 = scmp.ge.s32.totalorder %s648_s12, 2  }
 0x155   : >> { %669 = vmatpush.msra.mxu0 %v2544_v19  ;;  %1745 = vmatpush.msra.mxu1 %v2544_v19  ;;  %s2691_s17 = smov (%p645_p5), 0  }
 0x156   : >> { %1746 = vmatpush.msra.mxu2 %v2544_v19  ;;  %1747 = vmatpush.msra.mxu3 %v2544_v19 }
 0x157   : >> { %670 = vmatpush.msra.mxu0 %v2539_v18  ;;  %1748 = vmatpush.msra.mxu1 %v2539_v18 }
 0x158   : >> { %1749 = vmatpush.msra.mxu2 %v2539_v18  ;;  %1750 = vmatpush.msra.mxu3 %v2539_v18  ;;  %v651_v21 = vld [vmem:[%s2614_s14] sm:$0xff]  ;;  %v652_v25 = vld [vmem:[%s2614_s14 + $0x8] sm:$0xff]  ;;  %v653_v29 = vld [vmem:[%s2614_s14 + $0x10] sm:$0xff] }
 0x159   : >> { %671 = vmatpush.msra.mxu0 %v2534_v17  ;;  %1751 = vmatpush.msra.mxu1 %v2534_v17  ;;  %v655_v23 = vld [vmem:[%s2614_s14 + $0x20] sm:$0xff]  ;;  %v656_v26 = vld [vmem:[%s2614_s14 + $0x28] sm:$0xff]  ;;  %v657_v30 = vld [vmem:[%s2614_s14 + $0x30] sm:$0xff] }
 0x15a   : >> { %1752 = vmatpush.msra.mxu2 %v2534_v17  ;;  %1753 = vmatpush.msra.mxu3 %v2534_v17  ;;  %v659_v10 = vld [vmem:[%s2614_s14 + $0x40] sm:$0xff]  ;;  %v660_v27 = vld [vmem:[%s2614_s14 + $0x48] sm:$0xff]  ;;  %v661_v11 = vld [vmem:[%s2614_s14 + $0x50] sm:$0xff] }
 0x15b   : >> { %672 = vmatpush.msra.mxu0 %v2529_v16  ;;  %1754 = vmatpush.msra.mxu1 %v2529_v16  ;;  %v663_v24 = vld [vmem:[%s2614_s14 + $0x60] sm:$0xff]  ;;  %v664_v28 = vld [vmem:[%s2614_s14 + $0x68] sm:$0xff]  ;;  %v665_v31 = vld [vmem:[%s2614_s14 + $0x70] sm:$0xff] }
 0x15c   : >> { %1755 = vmatpush.msra.mxu2 %v2529_v16  ;;  %1756 = vmatpush.msra.mxu3 %v2529_v16  ;;  %v654_v32 = vld [vmem:[%s2614_s14 + $0x18] sm:$0xff] }
 0x15d   : >> { %673 = vmatpush.msra.mxu0 %v2524_v62  ;;  %1757 = vmatpush.msra.mxu1 %v2524_v62  ;;  %v658_v34 = vld [vmem:[%s2614_s14 + $0x38] sm:$0xff] }
 0x15e   : >> { %1758 = vmatpush.msra.mxu2 %v2524_v62  ;;  %1759 = vmatpush.msra.mxu3 %v2524_v62  ;;  %v662_v35 = vld [vmem:[%s2614_s14 + $0x58] sm:$0xff] }
 0x15f   : >> { %674 = vmatpush.msra.mxu0 %v2519_v15  ;;  %1760 = vmatpush.msra.mxu1 %v2519_v15  ;;  %v666_v22 = vld [vmem:[%s2614_s14 + $0x78] sm:$0xff] }
 0x160   : >> { %1761 = vmatpush.msra.mxu2 %v2519_v15  ;;  %1762 = vmatpush.msra.mxu3 %v2519_v15 }
 0x161   : >> { %675 = vmatpush.msra.mxu0 %v2513_v14  ;;  %1763 = vmatpush.msra.mxu1 %v2513_v14 }
 0x162   : >> { %1764 = vmatpush.msra.mxu2 %v2513_v14  ;;  %1765 = vmatpush.msra.mxu3 %v2513_v14 }
 0x163   : >> { %676 = vmatpush.msra.mxu0 %v2508_v13  ;;  %1766 = vmatpush.msra.mxu1 %v2508_v13 }
 0x164   : >> { %1767 = vmatpush.msra.mxu2 %v2508_v13  ;;  %1768 = vmatpush.msra.mxu3 %v2508_v13 }
 0x165   : >> { %677 = vmatpush.msra.mxu0 %v2503_v12  ;;  %1769 = vmatpush.msra.mxu1 %v2503_v12 }
 0x166   : >> { %1770 = vmatpush.msra.mxu2 %v2503_v12  ;;  %1771 = vmatpush.msra.mxu3 %v2503_v12 }
 0x167   : >> { %678 = vmatpush.msra.mxu0 %v2497_v4  ;;  %1772 = vmatpush.msra.mxu1 %v2497_v4 }
 0x168   : >> { %1773 = vmatpush.msra.mxu2 %v2497_v4  ;;  %1774 = vmatpush.msra.mxu3 %v2497_v4 }
 0x169   : >> { %679 = vmatpush.msra.mxu0 %v2492_v9  ;;  %1775 = vmatpush.msra.mxu1 %v2492_v9 }
 0x16a   : >> { %1776 = vmatpush.msra.mxu2 %v2492_v9  ;;  %1777 = vmatpush.msra.mxu3 %v2492_v9 }
 0x16b   : >> { %680 = vmatpush.msra.mxu0 %v2487_v8  ;;  %1778 = vmatpush.msra.mxu1 %v2487_v8 }
 0x16c   : >> { %1779 = vmatpush.msra.mxu2 %v2487_v8  ;;  %1780 = vmatpush.msra.mxu3 %v2487_v8 }
 0x16d   : >> { %681 = vmatpush.msra.mxu0 %v2482_v7  ;;  %1781 = vmatpush.msra.mxu1 %v2482_v7 }
 0x16e   : >> { %1782 = vmatpush.msra.mxu2 %v2482_v7  ;;  %1783 = vmatpush.msra.mxu3 %v2482_v7 }
 0x16f   : >> { %682 = vmatpush.msra.mxu0 %v2477_v6  ;;  %1784 = vmatpush.msra.mxu1 %v2477_v6 }
 0x170   : >> { %1785 = vmatpush.msra.mxu2 %v2477_v6  ;;  %1786 = vmatpush.msra.mxu3 %v2477_v6 }
 0x171   : >> { %683 = vmatpush.msra.mxu0 %v2472_v3  ;;  %1787 = vmatpush.msra.mxu1 %v2472_v3 }
 0x172   : >> { %684 = vmatmul.f32.vlgmr.msra.gmra.mxu0 %v651_v21  ;;  %696 = vmatmul.f32.vlgmr.msra.gmra.mxu1 %v655_v23 }
 0x173   : >> { %1788 = vmatpush.msra.mxu2 %v2472_v3  ;;  %1789 = vmatpush.msra.mxu3 %v2472_v3 }
 0x174   : >> { %708 = vmatmul.f32.vlgmr.msra.gmra.mxu2 %v659_v10  ;;  %720 = vmatmul.f32.vlgmr.msra.gmra.mxu3 %v663_v24 }
 0x17a   : >> { %687 = vmatmul.f32.gmra.mxu0 %v652_v25  ;;  %699 = vmatmul.f32.gmra.mxu1 %v656_v26 }
 0x17c   : >> { %711 = vmatmul.f32.gmra.mxu2 %v660_v27  ;;  %723 = vmatmul.f32.gmra.mxu3 %v664_v28 }
 0x182   : >> { %690 = vmatmul.f32.gmra.mxu0 %v653_v29  ;;  %702 = vmatmul.f32.gmra.mxu1 %v657_v30 }
 0x184   : >> { %714 = vmatmul.f32.gmra.mxu2 %v661_v11  ;;  %726 = vmatmul.f32.gmra.mxu3 %v665_v31 }
 0x18a   : >> { %693 = vmatmul.f32.gmra.mxu0 %v654_v32  ;;  %705 = vmatmul.f32.gmra.mxu1 %v658_v34 }
 0x18c   : >> { %717 = vmatmul.f32.gmra.mxu2 %v662_v35  ;;  %729 = vmatmul.f32.gmra.mxu3 %v666_v22 }
 0x1ef   : >> { %v685_v37 = vpop.f32.mrf.mxu0  ;;  %v697_v33 = vpop.f32.mrf.mxu1 }
 0x1f0   : >> { %v686_v38 = vadd.f32 %v685_v37, %v2640_v36  ;;  %v698_v39 = vadd.f32 %v697_v33, %v2640_v36 }
 0x1f2   : >> { %797 = vst [vmem:[%s2614_s14] sm:$0xff] %v686_v38  ;;  %v758_v57 = vmul.f32 %v686_v38, %v686_v38  ;;  %v762_v11 = vmul.f32 %v698_v39, %v698_v39 }
 0x1f3   : >> { %801 = vst [vmem:[%s2614_s14 + $0x20] sm:$0xff] %v698_v39 }
 0x1f7   : >> { %v688_v40 = vpop.f32.mrf.mxu0  ;;  %v700_v56 = vpop.f32.mrf.mxu1 }
 0x1f8   : >> { %v689_v41 = vadd.f32 %v688_v40, %v2640_v36  ;;  %v701_v42 = vadd.f32 %v700_v56, %v2640_v36  ;;  %v709_v43 = vpop.f32.mrf.mxu2  ;;  %v721_v44 = vpop.f32.mrf.mxu3 }
 0x1f9   : >> { %v710_v45 = vadd.f32 %v709_v43, %v2640_v36  ;;  %v2650_v46 = vadd.f32 %v721_v44, %v2640_v36 }
 0x1fa   : >> { %798 = vst [vmem:[%s2614_s14 + $0x8] sm:$0xff] %v689_v41  ;;  %v759_v55 = vmul.f32 %v689_v41, %v689_v41  ;;  %v734_v58 = vadd.f32 %v689_v41, %v686_v38  ;;  %v763_v34 = vmul.f32 %v701_v42, %v701_v42 }
 0x1fb   : >> { %802 = vst [vmem:[%s2614_s14 + $0x28] sm:$0xff] %v701_v42 }
 0x1fc   : >> { %805 = vst [vmem:[%s2614_s14 + $0x40] sm:$0xff] %v710_v45  ;;  %v774_v63 = vadd.f32 %v759_v55, %v758_v57 }
 0x1fd   : >> { %809 = vst [vmem:[%s2614_s14 + $0x60] sm:$0xff] %v2650_v46 }
 0x1ff   : >> { %v691_v47 = vpop.f32.mrf.mxu0  ;;  %v703_v48 = vpop.f32.mrf.mxu1 }
 0x200   : >> { %v692_v49 = vadd.f32 %v691_v47, %v2640_v36  ;;  %v704_v50 = vadd.f32 %v703_v48, %v2640_v36  ;;  %v712_v51 = vpop.f32.mrf.mxu2  ;;  %v724_v52 = vpop.f32.mrf.mxu3  ;;  %v766_v48 = vmul.f32 %v710_v45, %v710_v45 }
 0x201   : >> { %v713_v53 = vadd.f32 %v712_v51, %v2640_v36  ;;  %v725_v54 = vadd.f32 %v724_v52, %v2640_v36 }
 0x202   : >> { %799 = vst [vmem:[%s2614_s14 + $0x10] sm:$0xff] %v692_v49  ;;  %v760_v59 = vmul.f32 %v692_v49, %v692_v49  ;;  %v735_v21 = vadd.f32 %v734_v58, %v692_v49  ;;  %v764_v33 = vmul.f32 %v704_v50, %v704_v50 }
 0x203   : >> { %803 = vst [vmem:[%s2614_s14 + $0x30] sm:$0xff] %v704_v50  ;;  %v767_v52 = vmul.f32 %v713_v53, %v713_v53 }
 0x204   : >> { %806 = vst [vmem:[%s2614_s14 + $0x48] sm:$0xff] %v713_v53  ;;  %v775_v28 = vadd.f32 %v774_v63, %v760_v59  ;;  %v770_v63 = vmul.f32 %v2650_v46, %v2650_v46 }
 0x205   : >> { %810 = vst [vmem:[%s2614_s14 + $0x68] sm:$0xff] %v725_v54 }
 0x207   : >> { %v694_v60 = vpop.f32.mrf.mxu0  ;;  %v706_v61 = vpop.f32.mrf.mxu1 }
 0x208   : >> { %v695_v23 = vadd.f32 %v694_v60, %v2640_v36  ;;  %v707_v10 = vadd.f32 %v706_v61, %v2640_v36  ;;  %v715_v24 = vpop.f32.mrf.mxu2  ;;  %v727_v25 = vpop.f32.mrf.mxu3 }
 0x209   : >> { %v716_v26 = vadd.f32 %v715_v24, %v2640_v36  ;;  %v728_v27 = vadd.f32 %v727_v25, %v2640_v36 }
 0x20a   : >> { %v736_v29 = vadd.f32 %v735_v21, %v695_v23  ;;  %v761_v30 = vmul.f32 %v695_v23, %v695_v23  ;;  %800 = vst [vmem:[%s2614_s14 + $0x18] sm:$0xff] %v695_v23  ;;  %v765_v40 = vmul.f32 %v707_v10, %v707_v10  ;;  %v771_v23 = vmul.f32 %v725_v54, %v725_v54 }
 0x20b   : >> { %804 = vst [vmem:[%s2614_s14 + $0x38] sm:$0xff] %v707_v10  ;;  %v772_v25 = vmul.f32 %v728_v27, %v728_v27 }
 0x20c   : >> { %v737_v31 = vadd.f32 %v736_v29, %v698_v39  ;;  %v776_v32 = vadd.f32 %v775_v28, %v761_v30  ;;  %807 = vst [vmem:[%s2614_s14 + $0x50] sm:$0xff] %v716_v26 }
 0x20d   : >> { %811 = vst [vmem:[%s2614_s14 + $0x70] sm:$0xff] %v728_v27 }
 0x20e   : >> { %v777_v35 = vadd.f32 %v776_v32, %v762_v11  ;;  %v738_v22 = vadd.f32 %v737_v31, %v701_v42 }
 0x210   : >> { %v739_v37 = vadd.f32 %v738_v22, %v704_v50  ;;  %v778_v38 = vadd.f32 %v777_v35, %v763_v34  ;;  %v718_v56 = vpop.f32.mrf.mxu2  ;;  %v730_v41 = vpop.f32.mrf.mxu3  ;;  %v768_v50 = vmul.f32 %v716_v26, %v716_v26 }
 0x211   : >> { %v719_v43 = vadd.f32 %v718_v56, %v2640_v36  ;;  %v731_v44 = vadd.f32 %v730_v41, %v2640_v36 }
 0x212   : >> { %v779_v47 = vadd.f32 %v778_v38, %v764_v33  ;;  %v740_v39 = vadd.f32 %v739_v37, %v707_v10  ;;  %v733_v38 = vld [vmem:[#allocation3] sm:$0x1] }
 0x213   : >> { %808 = vst [vmem:[%s2614_s14 + $0x58] sm:$0xff] %v719_v43  ;;  %v769_v59 = vmul.f32 %v719_v43, %v719_v43  ;;  %v773_v29 = vmul.f32 %v731_v44, %v731_v44 }
 0x214   : >> { %v741_v49 = vadd.f32 %v740_v39, %v710_v45  ;;  %v780_v51 = vadd.f32 %v779_v47, %v765_v40  ;;  %812 = vst [vmem:[%s2614_s14 + $0x78] sm:$0xff] %v731_v44 }
 0x216   : >> { %v781_v55 = vadd.f32 %v780_v51, %v766_v48  ;;  %v742_v42 = vadd.f32 %v741_v49, %v713_v53 }
 0x218   : >> { %v743_v57 = vadd.f32 %v742_v42, %v716_v26  ;;  %v782_v58 = vadd.f32 %v781_v55, %v767_v52 }
 0x21a   : >> { %v783_v60 = vadd.f32 %v782_v58, %v768_v50  ;;  %v744_v61 = vadd.f32 %v743_v57, %v719_v43 }
 0x21c   : >> { %v745_v36 = vadd.f32 %v744_v61, %v2650_v46  ;;  %v784_v21 = vadd.f32 %v783_v60, %v769_v59 }
 0x21e   : >> { %v785_v10 = vadd.f32 %v784_v21, %v770_v63  ;;  %v746_v45 = vadd.f32 %v745_v36, %v725_v54  ;;  %v757_v54 = vld [vmem:[#allocation4] sm:$0x1] }
 0x220   : >> { %v747_v24 = vadd.f32 %v746_v45, %v728_v27  ;;  %v786_v28 = vadd.f32 %v785_v10, %v771_v23 }
 0x222   : >> { %v787_v53 = vadd.f32 %v786_v28, %v772_v25  ;;  %v748_v30 = vadd.f32 %v747_v24, %v731_v44 }
 0x224   : >> { %v749_v26 = vrot.slane %v748_v30, 4  ;;  %v788_v11 = vadd.f32 %v787_v53, %v773_v29 }
 0x226   : >> { %v750_v31 = vadd.f32 %v749_v26, %v748_v30  ;;  %v789_v32 = vrot.slane %v788_v11, 4 }
 0x228   : >> { %v751_v34 = vrot.slane %v750_v31, 2  ;;  %v790_v35 = vadd.f32 %v789_v32, %v788_v11 }
 0x22a   : >> { %v752_v22 = vadd.f32 %v751_v34, %v750_v31  ;;  %v791_v37 = vrot.slane %v790_v35, 2 }
 0x22c   : >> { %v753_v33 = vrot.slane %v752_v22, 1  ;;  %v792_v46 = vadd.f32 %v791_v37, %v790_v35 }
 0x22e   : >> { %v754_v40 = vadd.f32 %v753_v33, %v752_v22  ;;  %v793_v56 = vrot.slane %v792_v46, 1 }
 0x230   : >> { %v755_v41 = vadd.f32 %v754_v40, %v733_v38  ;;  %v794_v27 = vadd.f32 %v793_v56, %v792_v46  ;;  %647 = sbr.rel (!%p645_p5) target bundleno = 339 (0x153), region = 144 }
 0x232   : >> { %756 = vst [vmem:[#allocation3] sm:$0x1] %v755_v41  ;;  %v795_v43 = vadd.f32 %v794_v27, %v757_v54 }
 0x234   : >> { %796 = vst [vmem:[#allocation4] sm:$0x1] %v795_v43 }
 0x239   : > { %v813_v44 = vld [vmem:[#allocation3] sm:$0x1] }
 0x23a   : > { %v814_v39 = vmul.f32 0.00390625, %v813_v44 }
 0x23b   : > { %v815_v47 = vld [vmem:[#allocation4] sm:$0x1] }
 0x23c   : > { %v816_v48 = vmul.f32 0.00390625, %v815_v47  ;;  %v817_v49 = vmul.f32 %v814_v39, %v814_v39 }
 0x23e   : > { %v818_v51 = vsub.f32 %v816_v48, %v817_v49 }
 0x240   : > { %v819_v52 = vmax.f32 %v818_v51, 0.0 }
 0x242   : > { %v820_v55 = vadd.f32 1e-05, %v819_v52 }
 0x244   : > { %1979 = vrsqrt.f32 %v820_v55  ;;  %vm827_vm5 = vweird.f32 %v820_v55 }
 0x24a   : > { %v1980_v42 = vpop.eup %1979 }
 0x24b   : > { %v822_v57 = vmul.f32 %v1980_v42, %v820_v55  ;;  %vm828_vm6 = vweird.f32 %v1980_v42 }
 0x24c   : > { %vm829_vm7 = vmor %vm827_vm5, %vm828_vm6 }
 0x24d   : > { %v823_v50 = vmul.f32 %v1980_v42, %v822_v57 }
 0x24f   : > { %v824_v58 = vmul.f32 0.5, %v823_v50 }
 0x251   : > { %v825_v59 = vsub.f32 1.5, %v824_v58 }
 0x253   : > { %v826_v60 = vmul.f32 %v1980_v42, %v825_v59 }
 0x255   : > { %v830_v61 = vsel %vm829_vm7, %v1980_v42, %v826_v60 }
 0x256   : > { %v2684_v0 = vmul.f32 %v830_v61, %v2462_v1 }
 0x258   : > { %v2687_v3 = vmul.f32 %v2684_v0, %v814_v39 }
 0x25a   : > { %v833_v6 = vsub.f32 %v2467_v2, %v2687_v3 }
 0x25b LB: >> { %v2697_v7 = vperm.slane %v2684_v0, 0  ;;  %s1668_s18 = sshll.u32 %s2123_s17, 7  ;;  %s839_s17 = sadd.s32 1, %s2123_s17   ;;  %s2123_s17 = sphi %s2691_s17, %s839_s17  }
 0x25c   : >> { %v2703_v1 = vperm.slane %v833_v6, 0  ;;  %s2705_s21 = scalar_lea.vmem [#allocation2], %s1668_s18  ;;  %p836_p6 = scmp.ge.s32.totalorder %s839_s17, 2  }
 0x25d   : >> { %v842_v8 = vld [vmem:[%s2705_s21] sm:$0xff]  ;;  %v843_v9 = vld [vmem:[%s2705_s21 + $0x8] sm:$0xff]  ;;  %v844_v4 = vld [vmem:[%s2705_s21 + $0x10] sm:$0xff]  ;;  %992 = vst [vmem:[#allocation3] sm:$0x1] (%p836_p6), %v2138_v5  ;;  %s2871_s6 = smov (%p836_p6), 0  }
 0x25e   : >> { %v859_v12 = vmul.f32 %v2697_v7, %v842_v8  ;;  %v860_v13 = vmul.f32 %v2697_v7, %v843_v9  ;;  %v861_v14 = vmul.f32 %v2697_v7, %v844_v4  ;;  %v845_v15 = vld [vmem:[%s2705_s21 + $0x18] sm:$0xff]  ;;  %v846_v62 = vld [vmem:[%s2705_s21 + $0x20] sm:$0xff]  ;;  %v847_v16 = vld [vmem:[%s2705_s21 + $0x28] sm:$0xff]  ;;  %993 = vst [vmem:[#allocation4] sm:$0x1] (%p836_p6), %v2138_v5 }
 0x25f   : >> { %v862_v17 = vmul.f32 %v2697_v7, %v845_v15  ;;  %v863_v18 = vmul.f32 %v2697_v7, %v846_v62  ;;  %v864_v19 = vmul.f32 %v2697_v7, %v847_v16  ;;  %v848_v20 = vld [vmem:[%s2705_s21 + $0x30] sm:$0xff]  ;;  %v849_v63 = vld [vmem:[%s2705_s21 + $0x38] sm:$0xff]  ;;  %v850_v29 = vld [vmem:[%s2705_s21 + $0x40] sm:$0xff] }
 0x260   : >> { %v876_v36 = vadd.f32 %v2703_v1, %v859_v12  ;;  %v877_v21 = vadd.f32 %v2703_v1, %v860_v13  ;;  %v878_v23 = vadd.f32 %v2703_v1, %v861_v14  ;;  %v865_v10 = vmul.f32 %v2697_v7, %v848_v20  ;;  %v851_v53 = vld [vmem:[%s2705_s21 + $0x48] sm:$0xff]  ;;  %v852_v32 = vld [vmem:[%s2705_s21 + $0x50] sm:$0xff]  ;;  %v853_v34 = vld [vmem:[%s2705_s21 + $0x58] sm:$0xff] }
 0x261   : >> { %v879_v45 = vadd.f32 %v2703_v1, %v862_v17  ;;  %v880_v24 = vadd.f32 %v2703_v1, %v863_v18  ;;  %v881_v25 = vadd.f32 %v2703_v1, %v864_v19  ;;  %v866_v28 = vmul.f32 %v2697_v7, %v849_v63  ;;  %v854_v46 = vld [vmem:[%s2705_s21 + $0x60] sm:$0xff]  ;;  %v855_v54 = vld [vmem:[%s2705_s21 + $0x68] sm:$0xff]  ;;  %v856_v52 = vld [vmem:[%s2705_s21 + $0x70] sm:$0xff] }
 0x262   : >> { %v892_v30 = vmul.f32 0.5, %v876_v36  ;;  %v893_v26 = vmul.f32 0.5, %v877_v21  ;;  %v894_v11 = vmul.f32 0.5, %v878_v23  ;;  %v882_v31 = vadd.f32 %v2703_v1, %v865_v10  ;;  %v857_v55 = vld [vmem:[%s2705_s21 + $0x78] sm:$0xff]  ;;  %v2797_v2 = vld [vmem:[%s3335_s2 + $0x88] sm:$0xff] (%p836_p6)  ;;  %v2802_v0 = vld [vmem:[%s3335_s2 + $0x90] sm:$0xff] (%p836_p6) }
 0x263   : >> { %v895_v35 = vmul.f32 0.5, %v879_v45  ;;  %v896_v22 = vmul.f32 0.5, %v880_v24  ;;  %v897_v37 = vmul.f32 0.5, %v881_v25  ;;  %v883_v33 = vadd.f32 %v2703_v1, %v866_v28  ;;  %v2808_v3 = vld [vmem:[%s3335_s2 + $0x98] sm:$0xff] (%p836_p6)  ;;  %v2813_v6 = vld [vmem:[%s3335_s2 + $0xa0] sm:$0xff] (%p836_p6)  ;;  %v2844_v5 = vld [vmem:[%s3335_s2 + $0xd0] sm:$0xff] (%p836_p6) }
 0x264   : >> { %1981 = vtanh.f32 %v892_v30  ;;  %v898_v38 = vmul.f32 0.5, %v882_v31  ;;  %v867_v40 = vmul.f32 %v2697_v7, %v850_v29  ;;  %v868_v56 = vmul.f32 %v2697_v7, %v851_v53 }
 0x265   : >> { %1983 = vtanh.f32 %v893_v26  ;;  %v899_v41 = vmul.f32 0.5, %v883_v33  ;;  %v869_v27 = vmul.f32 %v2697_v7, %v852_v32  ;;  %v870_v43 = vmul.f32 %v2697_v7, %v853_v34 }
 0x266   : >> { %1985 = vtanh.f32 %v894_v11  ;;  %v884_v44 = vadd.f32 %v2703_v1, %v867_v40  ;;  %v885_v47 = vadd.f32 %v2703_v1, %v868_v56  ;;  %v871_v39 = vmul.f32 %v2697_v7, %v854_v46 }
 0x267   : >> { %1987 = vtanh.f32 %v895_v35  ;;  %v886_v48 = vadd.f32 %v2703_v1, %v869_v27  ;;  %v887_v49 = vadd.f32 %v2703_v1, %v870_v43  ;;  %v872_v51 = vmul.f32 %v2697_v7, %v855_v54 }
 0x268   : >> { %1989 = vtanh.f32 %v896_v22  ;;  %v900_v42 = vmul.f32 0.5, %v884_v44  ;;  %v888_v57 = vadd.f32 %v2703_v1, %v871_v39  ;;  %v901_v50 = vmul.f32 0.5, %v885_v47 }
 0x269   : >> { %1991 = vtanh.f32 %v897_v37  ;;  %v889_v58 = vadd.f32 %v2703_v1, %v872_v51  ;;  %v902_v60 = vmul.f32 0.5, %v886_v48  ;;  %v873_v61 = vmul.f32 %v2697_v7, %v856_v52 }
 0x26a   : >> { %v1982_v59 = vpop.eup %1981  ;;  %1993 = vtanh.f32 %v898_v38  ;;  %v874_v8 = vmul.f32 %v2697_v7, %v857_v55  ;;  %v903_v12 = vmul.f32 0.5, %v887_v49  ;;  %v904_v13 = vmul.f32 0.5, %v888_v57 }
 0x26b   : >> { %v1984_v9 = vpop.eup %1983  ;;  %v924_v4 = vadd.f32 1.0, %v1982_v59  ;;  %1995 = vtanh.f32 %v899_v41  ;;  %v890_v62 = vadd.f32 %v2703_v1, %v873_v61  ;;  %v905_v20 = vmul.f32 0.5, %v889_v58  ;;  %v2777_v58 = vld [vmem:[%s3336_s3 + $0x6] sm:$0x1] (%p836_p6)  ;;  %v2782_v59 = vld [vmem:[%s3336_s3 + $0x7] sm:$0x1] (%p836_p6) }
 0x26c   : >> { %v1986_v14 = vpop.eup %1985  ;;  %v925_v15 = vadd.f32 1.0, %v1984_v9  ;;  %1997 = vtanh.f32 %v900_v42  ;;  %v891_v16 = vadd.f32 %v2703_v1, %v874_v8  ;;  %v2792_v61 = vld [vmem:[%s3335_s2 + $0x80] sm:$0xff] (%p836_p6)  ;;  %v2818_v8 = vld [vmem:[%s3335_s2 + $0xa8] sm:$0xff] (%p836_p6)  ;;  %v2824_v9 = vld [vmem:[%s3335_s2 + $0xb0] sm:$0xff] (%p836_p6) }
 0x26d   : >> { %v1988_v17 = vpop.eup %1987  ;;  %v940_v18 = vmul.f32 0.5, %v924_v4  ;;  %v926_v19 = vadd.f32 1.0, %v1986_v14  ;;  %1999 = vtanh.f32 %v901_v50  ;;  %v906_v21 = vmul.f32 0.5, %v890_v62  ;;  %v2829_v4 = vld [vmem:[%s3335_s2 + $0xb8] sm:$0xff] (%p836_p6)  ;;  %v2859_v62 = vld [vmem:[%s3335_s2 + $0xe8] sm:$0xff] (%p836_p6) }
 0x26e   : >> { %v1990_v7 = vpop.eup %1989  ;;  %v941_v63 = vmul.f32 0.5, %v925_v15  ;;  %v927_v36 = vadd.f32 1.0, %v1988_v17  ;;  %2001 = vtanh.f32 %v902_v60  ;;  %v907_v24 = vmul.f32 0.5, %v891_v16  ;;  %v2787_v60 = vld [vmem:[%s3336_s3 + $0x8] sm:$0x1] (%p836_p6)  ;;  %v2849_v14 = vld [vmem:[%s3335_s2 + $0xd8] sm:$0xff] (%p836_p6) }
 0x26f   : >> { %v1992_v23 = vpop.eup %1991  ;;  %956 = vst [vmem:[%s2705_s21] sm:$0xff] %v940_v18  ;;  %v942_v10 = vmul.f32 0.5, %v926_v19  ;;  %v928_v45 = vadd.f32 1.0, %v1990_v7  ;;  %2003 = vtanh.f32 %v903_v12  ;;  %v2834_v12 = vld [vmem:[%s3335_s2 + $0xc0] sm:$0xff] (%p836_p6)  ;;  %v2864_v16 = vld [vmem:[%s3335_s2 + $0xf0] sm:$0xff] (%p836_p6)  ;;  %v2869_v17 = vld [vmem:[%s3335_s2 + $0xf8] sm:$0xff] (%p836_p6) }
 0x270   : >> { %v1994_v1 = vpop.eup %1993  ;;  %957 = vst [vmem:[%s2705_s21 + $0x8] sm:$0xff] %v941_v63  ;;  %v943_v25 = vmul.f32 0.5, %v927_v36  ;;  %v929_v28 = vadd.f32 1.0, %v1992_v23  ;;  %2005 = vtanh.f32 %v904_v13  ;;  %v2839_v13 = vld [vmem:[%s3335_s2 + $0xc8] sm:$0xff] (%p836_p6)  ;;  %v2854_v15 = vld [vmem:[%s3335_s2 + $0xe0] sm:$0xff] (%p836_p6) }
 0x271   : >> { %v1996_v29 = vpop.eup %1995  ;;  %958 = vst [vmem:[%s2705_s21 + $0x10] sm:$0xff] %v942_v10  ;;  %v944_v53 = vmul.f32 0.5, %v928_v45  ;;  %v930_v30 = vadd.f32 1.0, %v1994_v1  ;;  %2007 = vtanh.f32 %v905_v20 }
 0x272   : >> { %v1998_v26 = vpop.eup %1997  ;;  %959 = vst [vmem:[%s2705_s21 + $0x18] sm:$0xff] %v943_v25  ;;  %v945_v11 = vmul.f32 0.5, %v929_v28  ;;  %v931_v31 = vadd.f32 1.0, %v1996_v29  ;;  %2009 = vtanh.f32 %v906_v21 }
 0x273   : >> { %v2000_v32 = vpop.eup %1999  ;;  %960 = vst [vmem:[%s2705_s21 + $0x20] sm:$0xff] %v944_v53  ;;  %v946_v34 = vmul.f32 0.5, %v930_v30  ;;  %v932_v35 = vadd.f32 1.0, %v1998_v26  ;;  %2011 = vtanh.f32 %v907_v24 }
 0x274   : >> { %v2002_v22 = vpop.eup %2001  ;;  %961 = vst [vmem:[%s2705_s21 + $0x28] sm:$0xff] %v945_v11  ;;  %v947_v37 = vmul.f32 0.5, %v931_v31  ;;  %v933_v33 = vadd.f32 1.0, %v2000_v32 }
 0x275   : >> { %v2004_v46 = vpop.eup %2003  ;;  %962 = vst [vmem:[%s2705_s21 + $0x30] sm:$0xff] %v946_v34  ;;  %v948_v38 = vmul.f32 0.5, %v932_v35  ;;  %v934_v40 = vadd.f32 1.0, %v2002_v22 }
 0x276   : >> { %v2006_v56 = vpop.eup %2005  ;;  %963 = vst [vmem:[%s2705_s21 + $0x38] sm:$0xff] %v947_v37  ;;  %v949_v54 = vmul.f32 0.5, %v933_v33  ;;  %v935_v41 = vadd.f32 1.0, %v2004_v46 }
 0x277   : >> { %v2008_v27 = vpop.eup %2007  ;;  %964 = vst [vmem:[%s2705_s21 + $0x40] sm:$0xff] %v948_v38  ;;  %v950_v43 = vmul.f32 0.5, %v934_v40  ;;  %v936_v44 = vadd.f32 1.0, %v2006_v56 }
 0x278   : >> { %v2010_v47 = vpop.eup %2009  ;;  %965 = vst [vmem:[%s2705_s21 + $0x48] sm:$0xff] %v949_v54  ;;  %v951_v39 = vmul.f32 0.5, %v935_v41  ;;  %v937_v48 = vadd.f32 1.0, %v2008_v27 }
 0x279   : >> { %v2012_v49 = vpop.eup %2011  ;;  %966 = vst [vmem:[%s2705_s21 + $0x50] sm:$0xff] %v950_v43  ;;  %v952_v51 = vmul.f32 0.5, %v936_v44  ;;  %v938_v52 = vadd.f32 1.0, %v2010_v47 }
 0x27a   : >> { %967 = vst [vmem:[%s2705_s21 + $0x58] sm:$0xff] %v951_v39  ;;  %v953_v55 = vmul.f32 0.5, %v937_v48  ;;  %v939_v42 = vadd.f32 1.0, %v2012_v49  ;;  %838 = sbr.rel (!%p836_p6) target bundleno = 603 (0x25b), region = 155 }
 0x27b   : >> { %968 = vst [vmem:[%s2705_s21 + $0x60] sm:$0xff] %v952_v51  ;;  %v954_v57 = vmul.f32 0.5, %v938_v52 }
 0x27c   : >> { %969 = vst [vmem:[%s2705_s21 + $0x68] sm:$0xff] %v953_v55  ;;  %v955_v50 = vmul.f32 0.5, %v939_v42 }
 0x27d   : >> { %970 = vst [vmem:[%s2705_s21 + $0x70] sm:$0xff] %v954_v57 }
 0x27e   : >> { %971 = vst [vmem:[%s2705_s21 + $0x78] sm:$0xff] %v955_v50 }
 0x27f LB: >> { %1019 = vmatpush.msra.mxu0 %v2869_v17  ;;  %1790 = vmatpush.msra.mxu1 %v2869_v17  ;;  %s1685_s7 = sshll.u32 %s2127_s6, 7  ;;  %v2960_v30 = vperm.slane %v2777_v58, 0  ;;  %s999_s6 = sadd.s32 1, %s2127_s6   ;;  %s2127_s6 = sphi %s2871_s6, %s999_s6  }
 0x280   : >> { %1791 = vmatpush.msra.mxu2 %v2869_v17  ;;  %1792 = vmatpush.msra.mxu3 %v2869_v17  ;;  %s2934_s8 = scalar_lea.vmem [#allocation2], %s1685_s7  ;;  %p996_p7 = scmp.ge.s32.totalorder %s999_s6, 2  }
 0x281   : >> { %1020 = vmatpush.msra.mxu0 %v2864_v16  ;;  %1793 = vmatpush.msra.mxu1 %v2864_v16  ;;  %s3011_s9 = smov (%p996_p7), 0  }
 0x282   : >> { %1794 = vmatpush.msra.mxu2 %v2864_v16  ;;  %1795 = vmatpush.msra.mxu3 %v2864_v16 }
 0x283   : >> { %1021 = vmatpush.msra.mxu0 %v2859_v62  ;;  %1796 = vmatpush.msra.mxu1 %v2859_v62 }
 0x284   : >> { %1797 = vmatpush.msra.mxu2 %v2859_v62  ;;  %1798 = vmatpush.msra.mxu3 %v2859_v62 }
 0x285   : >> { %1022 = vmatpush.msra.mxu0 %v2854_v15  ;;  %1799 = vmatpush.msra.mxu1 %v2854_v15  ;;  %v1002_v18 = vld [vmem:[%s2934_s8] sm:$0xff]  ;;  %v1003_v63 = vld [vmem:[%s2934_s8 + $0x8] sm:$0xff]  ;;  %v1004_v10 = vld [vmem:[%s2934_s8 + $0x10] sm:$0xff] }
 0x286   : >> { %1800 = vmatpush.msra.mxu2 %v2854_v15  ;;  %1801 = vmatpush.msra.mxu3 %v2854_v15  ;;  %v1006_v19 = vld [vmem:[%s2934_s8 + $0x20] sm:$0xff]  ;;  %v1007_v36 = vld [vmem:[%s2934_s8 + $0x28] sm:$0xff]  ;;  %v1008_v45 = vld [vmem:[%s2934_s8 + $0x30] sm:$0xff] }
 0x287   : >> { %1023 = vmatpush.msra.mxu0 %v2849_v14  ;;  %1802 = vmatpush.msra.mxu1 %v2849_v14  ;;  %v1010_v20 = vld [vmem:[%s2934_s8 + $0x40] sm:$0xff]  ;;  %v1011_v21 = vld [vmem:[%s2934_s8 + $0x48] sm:$0xff]  ;;  %v1012_v24 = vld [vmem:[%s2934_s8 + $0x50] sm:$0xff] }
 0x288   : >> { %1803 = vmatpush.msra.mxu2 %v2849_v14  ;;  %1804 = vmatpush.msra.mxu3 %v2849_v14  ;;  %v1014_v7 = vld [vmem:[%s2934_s8 + $0x60] sm:$0xff]  ;;  %v1015_v23 = vld [vmem:[%s2934_s8 + $0x68] sm:$0xff]  ;;  %v1016_v1 = vld [vmem:[%s2934_s8 + $0x70] sm:$0xff] }
 0x289   : >> { %1024 = vmatpush.msra.mxu0 %v2844_v5  ;;  %1805 = vmatpush.msra.mxu1 %v2844_v5  ;;  %v1005_v25 = vld [vmem:[%s2934_s8 + $0x18] sm:$0xff] }
 0x28a   : >> { %1806 = vmatpush.msra.mxu2 %v2844_v5  ;;  %1807 = vmatpush.msra.mxu3 %v2844_v5  ;;  %v1009_v28 = vld [vmem:[%s2934_s8 + $0x38] sm:$0xff] }
 0x28b   : >> { %1025 = vmatpush.msra.mxu0 %v2839_v13  ;;  %1808 = vmatpush.msra.mxu1 %v2839_v13  ;;  %v1013_v29 = vld [vmem:[%s2934_s8 + $0x58] sm:$0xff] }
 0x28c   : >> { %1809 = vmatpush.msra.mxu2 %v2839_v13  ;;  %1810 = vmatpush.msra.mxu3 %v2839_v13  ;;  %v1017_v53 = vld [vmem:[%s2934_s8 + $0x78] sm:$0xff] }
 0x28d   : >> { %1026 = vmatpush.msra.mxu0 %v2834_v12  ;;  %1811 = vmatpush.msra.mxu1 %v2834_v12 }
 0x28e   : >> { %1812 = vmatpush.msra.mxu2 %v2834_v12  ;;  %1813 = vmatpush.msra.mxu3 %v2834_v12 }
 0x28f   : >> { %1027 = vmatpush.msra.mxu0 %v2829_v4  ;;  %1814 = vmatpush.msra.mxu1 %v2829_v4 }
 0x290   : >> { %1815 = vmatpush.msra.mxu2 %v2829_v4  ;;  %1816 = vmatpush.msra.mxu3 %v2829_v4 }
 0x291   : >> { %1028 = vmatpush.msra.mxu0 %v2824_v9  ;;  %1817 = vmatpush.msra.mxu1 %v2824_v9 }
 0x292   : >> { %1818 = vmatpush.msra.mxu2 %v2824_v9  ;;  %1819 = vmatpush.msra.mxu3 %v2824_v9 }
 0x293   : >> { %1029 = vmatpush.msra.mxu0 %v2818_v8  ;;  %1820 = vmatpush.msra.mxu1 %v2818_v8 }
 0x294   : >> { %1821 = vmatpush.msra.mxu2 %v2818_v8  ;;  %1822 = vmatpush.msra.mxu3 %v2818_v8 }
 0x295   : >> { %1030 = vmatpush.msra.mxu0 %v2813_v6  ;;  %1823 = vmatpush.msra.mxu1 %v2813_v6 }
 0x296   : >> { %1824 = vmatpush.msra.mxu2 %v2813_v6  ;;  %1825 = vmatpush.msra.mxu3 %v2813_v6 }
 0x297   : >> { %1031 = vmatpush.msra.mxu0 %v2808_v3  ;;  %1826 = vmatpush.msra.mxu1 %v2808_v3 }
 0x298   : >> { %1827 = vmatpush.msra.mxu2 %v2808_v3  ;;  %1828 = vmatpush.msra.mxu3 %v2808_v3 }
 0x299   : >> { %1032 = vmatpush.msra.mxu0 %v2802_v0  ;;  %1829 = vmatpush.msra.mxu1 %v2802_v0 }
 0x29a   : >> { %1830 = vmatpush.msra.mxu2 %v2802_v0  ;;  %1831 = vmatpush.msra.mxu3 %v2802_v0 }
 0x29b   : >> { %1033 = vmatpush.msra.mxu0 %v2797_v2  ;;  %1832 = vmatpush.msra.mxu1 %v2797_v2 }
 0x29c   : >> { %1833 = vmatpush.msra.mxu2 %v2797_v2  ;;  %1834 = vmatpush.msra.mxu3 %v2797_v2 }
 0x29d   : >> { %1034 = vmatpush.msra.mxu0 %v2792_v61  ;;  %1835 = vmatpush.msra.mxu1 %v2792_v61 }
 0x29e   : >> { %1035 = vmatmul.f32.vlgmr.msra.gmra.mxu0 %v1002_v18  ;;  %1047 = vmatmul.f32.vlgmr.msra.gmra.mxu1 %v1006_v19 }
 0x29f   : >> { %1836 = vmatpush.msra.mxu2 %v2792_v61  ;;  %1837 = vmatpush.msra.mxu3 %v2792_v61 }
 0x2a0   : >> { %1059 = vmatmul.f32.vlgmr.msra.gmra.mxu2 %v1010_v20  ;;  %1071 = vmatmul.f32.vlgmr.msra.gmra.mxu3 %v1014_v7 }
 0x2a6   : >> { %1038 = vmatmul.f32.gmra.mxu0 %v1003_v63  ;;  %1050 = vmatmul.f32.gmra.mxu1 %v1007_v36 }
 0x2a8   : >> { %1062 = vmatmul.f32.gmra.mxu2 %v1011_v21  ;;  %1074 = vmatmul.f32.gmra.mxu3 %v1015_v23 }
 0x2ae   : >> { %1041 = vmatmul.f32.gmra.mxu0 %v1004_v10  ;;  %1053 = vmatmul.f32.gmra.mxu1 %v1008_v45 }
 0x2b0   : >> { %1065 = vmatmul.f32.gmra.mxu2 %v1012_v24  ;;  %1077 = vmatmul.f32.gmra.mxu3 %v1016_v1 }
 0x2b6   : >> { %1044 = vmatmul.f32.gmra.mxu0 %v1005_v25  ;;  %1056 = vmatmul.f32.gmra.mxu1 %v1009_v28 }
 0x2b8   : >> { %1068 = vmatmul.f32.gmra.mxu2 %v1013_v29  ;;  %1080 = vmatmul.f32.gmra.mxu3 %v1017_v53 }
 0x31b   : >> { %v1036_v26 = vpop.f32.mrf.mxu0  ;;  %v1048_v11 = vpop.f32.mrf.mxu1 }
 0x31c   : >> { %v1037_v31 = vadd.f32 %v1036_v26, %v2960_v30  ;;  %v1049_v32 = vadd.f32 %v1048_v11, %v2960_v30 }
 0x31e   : >> { %1148 = vst [vmem:[%s2934_s8] sm:$0xff] %v1037_v31  ;;  %v1109_v49 = vmul.f32 %v1037_v31, %v1037_v31  ;;  %v1113_v45 = vmul.f32 %v1049_v32, %v1049_v32 }
 0x31f   : >> { %1152 = vst [vmem:[%s2934_s8 + $0x20] sm:$0xff] %v1049_v32 }
 0x323   : >> { %v1039_v34 = vpop.f32.mrf.mxu0  ;;  %v1051_v35 = vpop.f32.mrf.mxu1 }
 0x324   : >> { %v1040_v22 = vadd.f32 %v1039_v34, %v2960_v30  ;;  %v1052_v37 = vadd.f32 %v1051_v35, %v2960_v30  ;;  %v1060_v33 = vpop.f32.mrf.mxu2  ;;  %v1072_v46 = vpop.f32.mrf.mxu3 }
 0x325   : >> { %v1061_v38 = vadd.f32 %v1060_v33, %v2960_v30  ;;  %v2970_v40 = vadd.f32 %v1072_v46, %v2960_v30 }
 0x326   : >> { %1149 = vst [vmem:[%s2934_s8 + $0x8] sm:$0xff] %v1040_v22  ;;  %v1110_v48 = vmul.f32 %v1040_v22, %v1040_v22  ;;  %v1085_v51 = vadd.f32 %v1040_v22, %v1037_v31  ;;  %v1114_v25 = vmul.f32 %v1052_v37, %v1052_v37 }
 0x327   : >> { %1153 = vst [vmem:[%s2934_s8 + $0x28] sm:$0xff] %v1052_v37 }
 0x328   : >> { %1156 = vst [vmem:[%s2934_s8 + $0x40] sm:$0xff] %v1061_v38  ;;  %v1125_v57 = vadd.f32 %v1110_v48, %v1109_v49 }
 0x329   : >> { %1160 = vst [vmem:[%s2934_s8 + $0x60] sm:$0xff] %v2970_v40 }
 0x32b   : >> { %v1042_v56 = vpop.f32.mrf.mxu0  ;;  %v1054_v54 = vpop.f32.mrf.mxu1 }
 0x32c   : >> { %v1043_v41 = vadd.f32 %v1042_v56, %v2960_v30  ;;  %v1055_v27 = vadd.f32 %v1054_v54, %v2960_v30  ;;  %v1063_v43 = vpop.f32.mrf.mxu2  ;;  %v1075_v44 = vpop.f32.mrf.mxu3  ;;  %v1117_v56 = vmul.f32 %v1061_v38, %v1061_v38 }
 0x32d   : >> { %v1064_v47 = vadd.f32 %v1063_v43, %v2960_v30  ;;  %v1076_v39 = vadd.f32 %v1075_v44, %v2960_v30 }
 0x32e   : >> { %1150 = vst [vmem:[%s2934_s8 + $0x10] sm:$0xff] %v1043_v41  ;;  %v1111_v52 = vmul.f32 %v1043_v41, %v1043_v41  ;;  %v1086_v50 = vadd.f32 %v1085_v51, %v1043_v41  ;;  %v1115_v26 = vmul.f32 %v1055_v27, %v1055_v27 }
 0x32f   : >> { %1154 = vst [vmem:[%s2934_s8 + $0x30] sm:$0xff] %v1055_v27  ;;  %v1118_v43 = vmul.f32 %v1064_v47, %v1064_v47 }
 0x330   : >> { %1157 = vst [vmem:[%s2934_s8 + $0x48] sm:$0xff] %v1064_v47  ;;  %v1126_v21 = vadd.f32 %v1125_v57, %v1111_v52 }
 0x331   : >> { %1161 = vst [vmem:[%s2934_s8 + $0x68] sm:$0xff] %v1076_v39 }
 0x333   : >> { %v1045_v55 = vpop.f32.mrf.mxu0  ;;  %v1057_v42 = vpop.f32.mrf.mxu1 }
 0x334   : >> { %v1046_v18 = vadd.f32 %v1045_v55, %v2960_v30  ;;  %v1058_v19 = vadd.f32 %v1057_v42, %v2960_v30  ;;  %v1066_v20 = vpop.f32.mrf.mxu2  ;;  %v1078_v7 = vpop.f32.mrf.mxu3  ;;  %v1121_v42 = vmul.f32 %v2970_v40, %v2970_v40 }
 0x335   : >> { %v1067_v63 = vadd.f32 %v1066_v20, %v2960_v30  ;;  %v1079_v36 = vadd.f32 %v1078_v7, %v2960_v30 }
 0x336   : >> { %v1087_v23 = vadd.f32 %v1086_v50, %v1046_v18  ;;  %v1112_v10 = vmul.f32 %v1046_v18, %v1046_v18  ;;  %1151 = vst [vmem:[%s2934_s8 + $0x18] sm:$0xff] %v1046_v18  ;;  %v1116_v31 = vmul.f32 %v1058_v19, %v1058_v19  ;;  %v1122_v50 = vmul.f32 %v1076_v39, %v1076_v39 }
 0x337   : >> { %1155 = vst [vmem:[%s2934_s8 + $0x38] sm:$0xff] %v1058_v19  ;;  %v1123_v20 = vmul.f32 %v1079_v36, %v1079_v36 }
 0x338   : >> { %v1088_v24 = vadd.f32 %v1087_v23, %v1049_v32  ;;  %v1127_v1 = vadd.f32 %v1126_v21, %v1112_v10  ;;  %1158 = vst [vmem:[%s2934_s8 + $0x50] sm:$0xff] %v1067_v63 }
 0x339   : >> { %1162 = vst [vmem:[%s2934_s8 + $0x70] sm:$0xff] %v1079_v36 }
 0x33a   : >> { %v1128_v28 = vadd.f32 %v1127_v1, %v1113_v45  ;;  %v1089_v29 = vadd.f32 %v1088_v24, %v1052_v37 }
 0x33c   : >> { %v1090_v53 = vadd.f32 %v1089_v29, %v1055_v27  ;;  %v1129_v11 = vadd.f32 %v1128_v28, %v1114_v25  ;;  %v1069_v34 = vpop.f32.mrf.mxu2  ;;  %v1081_v35 = vpop.f32.mrf.mxu3  ;;  %v1119_v27 = vmul.f32 %v1067_v63, %v1067_v63 }
 0x33d   : >> { %v1070_v22 = vadd.f32 %v1069_v34, %v2960_v30  ;;  %v1082_v33 = vadd.f32 %v1081_v35, %v2960_v30 }
 0x33e   : >> { %v1130_v46 = vadd.f32 %v1129_v11, %v1115_v26  ;;  %v1091_v32 = vadd.f32 %v1090_v53, %v1058_v19  ;;  %v1084_v26 = vld [vmem:[#allocation3] sm:$0x1] }
 0x33f   : >> { %1159 = vst [vmem:[%s2934_s8 + $0x58] sm:$0xff] %v1070_v22  ;;  %v1120_v51 = vmul.f32 %v1070_v22, %v1070_v22  ;;  %v1124_v21 = vmul.f32 %v1082_v33, %v1082_v33 }
 0x340   : >> { %v1092_v54 = vadd.f32 %v1091_v32, %v1061_v38  ;;  %v1131_v41 = vadd.f32 %v1130_v46, %v1116_v31  ;;  %1163 = vst [vmem:[%s2934_s8 + $0x78] sm:$0xff] %v1082_v33 }
 0x342   : >> { %v1132_v44 = vadd.f32 %v1131_v41, %v1117_v56  ;;  %v1093_v37 = vadd.f32 %v1092_v54, %v1064_v47 }
 0x344   : >> { %v1094_v48 = vadd.f32 %v1093_v37, %v1067_v63  ;;  %v1133_v49 = vadd.f32 %v1132_v44, %v1118_v43 }
 0x346   : >> { %v1134_v52 = vadd.f32 %v1133_v49, %v1119_v27  ;;  %v1095_v55 = vadd.f32 %v1094_v48, %v1070_v22 }
 0x348   : >> { %v1096_v30 = vadd.f32 %v1095_v55, %v2970_v40  ;;  %v1135_v57 = vadd.f32 %v1134_v52, %v1120_v51 }
 0x34a   : >> { %v1136_v18 = vadd.f32 %v1135_v57, %v1121_v42  ;;  %v1097_v38 = vadd.f32 %v1096_v30, %v1076_v39  ;;  %v1108_v39 = vld [vmem:[#allocation4] sm:$0x1] }
 0x34c   : >> { %v1098_v19 = vadd.f32 %v1097_v38, %v1079_v36  ;;  %v1137_v7 = vadd.f32 %v1136_v18, %v1122_v50 }
 0x34e   : >> { %v1138_v47 = vadd.f32 %v1137_v7, %v1123_v20  ;;  %v1099_v23 = vadd.f32 %v1098_v19, %v1082_v33 }
 0x350   : >> { %v1100_v63 = vrot.slane %v1099_v23, 4  ;;  %v1139_v10 = vadd.f32 %v1138_v47, %v1124_v21 }
 0x352   : >> { %v1101_v45 = vadd.f32 %v1100_v63, %v1099_v23  ;;  %v1140_v24 = vrot.slane %v1139_v10, 4 }
 0x354   : >> { %v1102_v1 = vrot.slane %v1101_v45, 2  ;;  %v1141_v25 = vadd.f32 %v1140_v24, %v1139_v10 }
 0x356   : >> { %v1103_v28 = vadd.f32 %v1102_v1, %v1101_v45  ;;  %v1142_v29 = vrot.slane %v1141_v25, 2 }
 0x358   : >> { %v1104_v53 = vrot.slane %v1103_v28, 1  ;;  %v1143_v40 = vadd.f32 %v1142_v29, %v1141_v25 }
 0x35a   : >> { %v1105_v11 = vadd.f32 %v1104_v53, %v1103_v28  ;;  %v1144_v31 = vrot.slane %v1143_v40, 1 }
 0x35c   : >> { %v1106_v34 = vadd.f32 %v1105_v11, %v1084_v26  ;;  %v1145_v36 = vadd.f32 %v1144_v31, %v1143_v40  ;;  %998 = sbr.rel (!%p996_p7) target bundleno = 639 (0x27f), region = 166 }
 0x35e   : >> { %1107 = vst [vmem:[#allocation3] sm:$0x1] %v1106_v34  ;;  %v1146_v35 = vadd.f32 %v1145_v36, %v1108_v39 }
 0x360   : >> { %1147 = vst [vmem:[#allocation4] sm:$0x1] %v1146_v35 }
 0x365   : > { %v1164_v22 = vld [vmem:[#allocation3] sm:$0x1] }
 0x366   : > { %v1165_v46 = vmul.f32 0.00390625, %v1164_v22 }
 0x367   : > { %v1166_v33 = vld [vmem:[#allocation4] sm:$0x1] }
 0x368   : > { %v1167_v32 = vmul.f32 0.00390625, %v1166_v33  ;;  %v1168_v56 = vmul.f32 %v1165_v46, %v1165_v46 }
 0x36a   : > { %v1169_v54 = vsub.f32 %v1167_v32, %v1168_v56 }
 0x36c   : > { %v1170_v41 = vmax.f32 %v1169_v54, 0.0 }
 0x36e   : > { %v1171_v43 = vadd.f32 1e-05, %v1170_v41 }
 0x370   : > { %2013 = vrsqrt.f32 %v1171_v43  ;;  %vm1178_vm8 = vweird.f32 %v1171_v43 }
 0x376   : > { %v2014_v44 = vpop.eup %2013 }
 0x377   : > { %v1173_v37 = vmul.f32 %v2014_v44, %v1171_v43  ;;  %vm1179_vm9 = vweird.f32 %v2014_v44 }
 0x378   : > { %vm1180_vm10 = vmor %vm1178_vm8, %vm1179_vm9 }
 0x379   : > { %v1174_v48 = vmul.f32 %v2014_v44, %v1173_v37 }
 0x37b   : > { %v1175_v27 = vmul.f32 0.5, %v1174_v48 }
 0x37d   : > { %v1176_v49 = vsub.f32 1.5, %v1175_v27 }
 0x37f   : > { %v1177_v51 = vmul.f32 %v2014_v44, %v1176_v49 }
 0x381   : > { %v1181_v52 = vsel %vm1180_vm10, %v2014_v44, %v1177_v51 }
 0x382   : > { %v3004_v58 = vmul.f32 %v1181_v52, %v2782_v59 }
 0x384   : > { %v3007_v61 = vmul.f32 %v3004_v58, %v1165_v46 }
 0x386   : > { %v1184_v2 = vsub.f32 %v2787_v60, %v3007_v61 }
 0x387 LB: >> { %v3017_v0 = vperm.slane %v3004_v58, 0  ;;  %s1686_s10 = sshll.u32 %s2131_s9, 7  ;;  %s1190_s9 = sadd.s32 1, %s2131_s9   ;;  %s2131_s9 = sphi %s3011_s9, %s1190_s9  }
 0x388   : >> { %v3023_v59 = vperm.slane %v1184_v2, 0  ;;  %s3025_s11 = scalar_lea.vmem [#allocation2], %s1686_s10  ;;  %p1187_p8 = scmp.ge.s32.totalorder %s1190_s9, 2  }
 0x389   : >> { %v1193_v3 = vld [vmem:[%s3025_s11] sm:$0xff]  ;;  %v1194_v6 = vld [vmem:[%s3025_s11 + $0x8] sm:$0xff]  ;;  %v1195_v8 = vld [vmem:[%s3025_s11 + $0x10] sm:$0xff]  ;;  %s3179_s22 = smov (%p1187_p8), 0  }
 0x38a   : >> { %v1210_v9 = vmul.f32 %v3017_v0, %v1193_v3  ;;  %v1211_v4 = vmul.f32 %v3017_v0, %v1194_v6  ;;  %v1212_v12 = vmul.f32 %v3017_v0, %v1195_v8  ;;  %v1196_v13 = vld [vmem:[%s3025_s11 + $0x18] sm:$0xff]  ;;  %v1197_v5 = vld [vmem:[%s3025_s11 + $0x20] sm:$0xff]  ;;  %v1198_v14 = vld [vmem:[%s3025_s11 + $0x28] sm:$0xff] }
 0x38b   : >> { %v1213_v15 = vmul.f32 %v3017_v0, %v1196_v13  ;;  %v1214_v62 = vmul.f32 %v3017_v0, %v1197_v5  ;;  %v1215_v16 = vmul.f32 %v3017_v0, %v1198_v14  ;;  %v1199_v17 = vld [vmem:[%s3025_s11 + $0x30] sm:$0xff]  ;;  %v1200_v55 = vld [vmem:[%s3025_s11 + $0x38] sm:$0xff]  ;;  %v1201_v7 = vld [vmem:[%s3025_s11 + $0x40] sm:$0xff] }
 0x38c   : >> { %v1227_v42 = vadd.f32 %v3023_v59, %v1210_v9  ;;  %v1228_v30 = vadd.f32 %v3023_v59, %v1211_v4  ;;  %v1229_v57 = vadd.f32 %v3023_v59, %v1212_v12  ;;  %v1216_v50 = vmul.f32 %v3017_v0, %v1199_v17  ;;  %v1202_v21 = vld [vmem:[%s3025_s11 + $0x48] sm:$0xff]  ;;  %v1203_v45 = vld [vmem:[%s3025_s11 + $0x50] sm:$0xff]  ;;  %v1204_v24 = vld [vmem:[%s3025_s11 + $0x58] sm:$0xff] }
 0x38d   : >> { %v1230_v18 = vadd.f32 %v3023_v59, %v1213_v15  ;;  %v1231_v38 = vadd.f32 %v3023_v59, %v1214_v62  ;;  %v1232_v19 = vadd.f32 %v3023_v59, %v1215_v16  ;;  %v1217_v20 = vmul.f32 %v3017_v0, %v1200_v55  ;;  %v1205_v53 = vld [vmem:[%s3025_s11 + $0x60] sm:$0xff]  ;;  %v1206_v31 = vld [vmem:[%s3025_s11 + $0x68] sm:$0xff]  ;;  %v1207_v54 = vld [vmem:[%s3025_s11 + $0x70] sm:$0xff] }
 0x38e   : >> { %v1243_v47 = vmul.f32 0.5, %v1227_v42  ;;  %v1244_v23 = vmul.f32 0.5, %v1228_v30  ;;  %v1245_v63 = vmul.f32 0.5, %v1229_v57  ;;  %v1233_v10 = vadd.f32 %v3023_v59, %v1216_v50  ;;  %v1208_v41 = vld [vmem:[%s3025_s11 + $0x78] sm:$0xff]  ;;  %v3117_v60 = vld [vmem:[%s3335_s2 + $0x120] sm:$0xff] (%p1187_p8)  ;;  %v3122_v58 = vld [vmem:[%s3335_s2 + $0x128] sm:$0xff] (%p1187_p8) }
 0x38f   : >> { %v1246_v1 = vmul.f32 0.5, %v1230_v18  ;;  %v1247_v25 = vmul.f32 0.5, %v1231_v38  ;;  %v1248_v28 = vmul.f32 0.5, %v1232_v19  ;;  %v1234_v29 = vadd.f32 %v3023_v59, %v1217_v20  ;;  %v3127_v61 = vld [vmem:[%s3335_s2 + $0x130] sm:$0xff] (%p1187_p8)  ;;  %v3132_v2 = vld [vmem:[%s3335_s2 + $0x138] sm:$0xff] (%p1187_p8) }
 0x390   : >> { %2015 = vtanh.f32 %v1243_v47  ;;  %v1249_v40 = vmul.f32 0.5, %v1233_v10  ;;  %v1218_v26 = vmul.f32 %v3017_v0, %v1201_v7  ;;  %v1219_v11 = vmul.f32 %v3017_v0, %v1202_v21 }
 0x391   : >> { %2017 = vtanh.f32 %v1244_v23  ;;  %v1250_v39 = vmul.f32 0.5, %v1234_v29  ;;  %v1220_v34 = vmul.f32 %v3017_v0, %v1203_v45  ;;  %v1221_v36 = vmul.f32 %v3017_v0, %v1204_v24 }
 0x392   : >> { %2019 = vtanh.f32 %v1245_v63  ;;  %v1235_v35 = vadd.f32 %v3023_v59, %v1218_v26  ;;  %v1236_v22 = vadd.f32 %v3023_v59, %v1219_v11  ;;  %v1222_v33 = vmul.f32 %v3017_v0, %v1205_v53 }
 0x393   : >> { %2021 = vtanh.f32 %v1246_v1  ;;  %v1237_v46 = vadd.f32 %v3023_v59, %v1220_v34  ;;  %v1238_v32 = vadd.f32 %v3023_v59, %v1221_v36  ;;  %v1223_v56 = vmul.f32 %v3017_v0, %v1206_v31 }
 0x394   : >> { %2023 = vtanh.f32 %v1247_v25  ;;  %v1251_v43 = vmul.f32 0.5, %v1235_v35  ;;  %v1239_v44 = vadd.f32 %v3023_v59, %v1222_v33  ;;  %v1252_v37 = vmul.f32 0.5, %v1236_v22 }
 0x395   : >> { %2025 = vtanh.f32 %v1248_v28  ;;  %v1240_v48 = vadd.f32 %v3023_v59, %v1223_v56  ;;  %v1253_v49 = vmul.f32 0.5, %v1237_v46  ;;  %v1224_v51 = vmul.f32 %v3017_v0, %v1207_v54 }
 0x396   : >> { %v2016_v27 = vpop.eup %2015  ;;  %2027 = vtanh.f32 %v1249_v40  ;;  %v1225_v52 = vmul.f32 %v3017_v0, %v1208_v41  ;;  %v1254_v8 = vmul.f32 0.5, %v1238_v32  ;;  %v1255_v9 = vmul.f32 0.5, %v1239_v44 }
 0x397   : >> { %v2018_v3 = vpop.eup %2017  ;;  %v1275_v6 = vadd.f32 1.0, %v2016_v27  ;;  %2029 = vtanh.f32 %v1250_v39  ;;  %v1241_v13 = vadd.f32 %v3023_v59, %v1224_v51  ;;  %v1256_v16 = vmul.f32 0.5, %v1240_v48  ;;  %v3102_v48 = vld [vmem:[%s3335_s2 + $0x108] sm:$0xff] (%p1187_p8)  ;;  %v3107_v27 = vld [vmem:[%s3335_s2 + $0x110] sm:$0xff] (%p1187_p8)  ;;  %v3137_v51 = vld [vmem:[%s3335_s2 + $0x140] sm:$0xff] (%p1187_p8) }
 0x398   : >> { %v2020_v4 = vpop.eup %2019  ;;  %v1276_v12 = vadd.f32 1.0, %v2018_v3  ;;  %2031 = vtanh.f32 %v1251_v43  ;;  %v1242_v5 = vadd.f32 %v3023_v59, %v1225_v52  ;;  %v3142_v52 = vld [vmem:[%s3335_s2 + $0x148] sm:$0xff] (%p1187_p8)  ;;  %v3147_v3 = vld [vmem:[%s3335_s2 + $0x150] sm:$0xff] (%p1187_p8) }
 0x399   : >> { %v2022_v14 = vpop.eup %2021  ;;  %v1291_v15 = vmul.f32 0.5, %v1275_v6  ;;  %v1277_v62 = vadd.f32 1.0, %v2020_v4  ;;  %2033 = vtanh.f32 %v1252_v37  ;;  %v1257_v42 = vmul.f32 0.5, %v1241_v13  ;;  %v3097_v37 = vld [vmem:[%s3335_s2 + $0x100] sm:$0xff] (%p1187_p8)  ;;  %v3152_v6 = vld [vmem:[%s3335_s2 + $0x158] sm:$0xff] (%p1187_p8)  ;;  %v3167_v4 = vld [vmem:[%s3335_s2 + $0x170] sm:$0xff] (%p1187_p8) }
 0x39a   : >> { %v2024_v0 = vpop.eup %2023  ;;  %v1292_v17 = vmul.f32 0.5, %v1276_v12  ;;  %v1278_v55 = vadd.f32 1.0, %v2022_v14  ;;  %2035 = vtanh.f32 %v1253_v49  ;;  %v1258_v18 = vmul.f32 0.5, %v1242_v5  ;;  %v3112_v49 = vld [vmem:[%s3335_s2 + $0x118] sm:$0xff] (%p1187_p8)  ;;  %v3177_v13 = vld [vmem:[%s3336_s3 + $0x9] sm:$0x1] (%p1187_p8) }
 0x39b   : >> { %v2026_v30 = vpop.eup %2025  ;;  %1307 = vst [vmem:[%s3025_s11] sm:$0xff] %v1291_v15  ;;  %v1293_v57 = vmul.f32 0.5, %v1277_v62  ;;  %v1279_v50 = vadd.f32 1.0, %v2024_v0  ;;  %2037 = vtanh.f32 %v1254_v8  ;;  %v3157_v8 = vld [vmem:[%s3335_s2 + $0x160] sm:$0xff] (%p1187_p8)  ;;  %v3172_v12 = vld [vmem:[%s3335_s2 + $0x178] sm:$0xff] (%p1187_p8) }
 0x39c   : >> { %v2028_v59 = vpop.eup %2027  ;;  %1308 = vst [vmem:[%s3025_s11 + $0x8] sm:$0xff] %v1292_v17  ;;  %v1294_v38 = vmul.f32 0.5, %v1278_v55  ;;  %v1280_v19 = vadd.f32 1.0, %v2026_v30  ;;  %2039 = vtanh.f32 %v1255_v9  ;;  %v3162_v9 = vld [vmem:[%s3335_s2 + $0x168] sm:$0xff] (%p1187_p8) }
 0x39d   : >> { %v2030_v20 = vpop.eup %2029  ;;  %1309 = vst [vmem:[%s3025_s11 + $0x10] sm:$0xff] %v1293_v57  ;;  %v1295_v7 = vmul.f32 0.5, %v1279_v50  ;;  %v1281_v21 = vadd.f32 1.0, %v2028_v59  ;;  %2041 = vtanh.f32 %v1256_v16 }
 0x39e   : >> { %v2032_v47 = vpop.eup %2031  ;;  %1310 = vst [vmem:[%s3025_s11 + $0x18] sm:$0xff] %v1294_v38  ;;  %v1296_v23 = vmul.f32 0.5, %v1280_v19  ;;  %v1282_v63 = vadd.f32 1.0, %v2030_v20  ;;  %2043 = vtanh.f32 %v1257_v42 }
 0x39f   : >> { %v2034_v10 = vpop.eup %2033  ;;  %1311 = vst [vmem:[%s3025_s11 + $0x20] sm:$0xff] %v1295_v7  ;;  %v1297_v45 = vmul.f32 0.5, %v1281_v21  ;;  %v1283_v24 = vadd.f32 1.0, %v2032_v47  ;;  %2045 = vtanh.f32 %v1258_v18 }
 0x3a0   : >> { %v2036_v1 = vpop.eup %2035  ;;  %1312 = vst [vmem:[%s3025_s11 + $0x28] sm:$0xff] %v1296_v23  ;;  %v1298_v25 = vmul.f32 0.5, %v1282_v63  ;;  %v1284_v28 = vadd.f32 1.0, %v2034_v10 }
 0x3a1   : >> { %v2038_v29 = vpop.eup %2037  ;;  %1313 = vst [vmem:[%s3025_s11 + $0x30] sm:$0xff] %v1297_v45  ;;  %v1299_v53 = vmul.f32 0.5, %v1283_v24  ;;  %v1285_v40 = vadd.f32 1.0, %v2036_v1 }
 0x3a2   : >> { %v2040_v26 = vpop.eup %2039  ;;  %1314 = vst [vmem:[%s3025_s11 + $0x38] sm:$0xff] %v1298_v25  ;;  %v1300_v11 = vmul.f32 0.5, %v1284_v28  ;;  %v1286_v31 = vadd.f32 1.0, %v2038_v29 }
 0x3a3   : >> { %v2042_v39 = vpop.eup %2041  ;;  %1315 = vst [vmem:[%s3025_s11 + $0x40] sm:$0xff] %v1299_v53  ;;  %v1301_v34 = vmul.f32 0.5, %v1285_v40  ;;  %v1287_v36 = vadd.f32 1.0, %v2040_v26 }
 0x3a4   : >> { %v2044_v35 = vpop.eup %2043  ;;  %1316 = vst [vmem:[%s3025_s11 + $0x48] sm:$0xff] %v1300_v11  ;;  %v1302_v22 = vmul.f32 0.5, %v1286_v31  ;;  %v1288_v33 = vadd.f32 1.0, %v2042_v39 }
 0x3a5   : >> { %v2046_v46 = vpop.eup %2045  ;;  %1317 = vst [vmem:[%s3025_s11 + $0x50] sm:$0xff] %v1301_v34  ;;  %v1303_v32 = vmul.f32 0.5, %v1287_v36  ;;  %v1289_v56 = vadd.f32 1.0, %v2044_v35 }
 0x3a6   : >> { %1318 = vst [vmem:[%s3025_s11 + $0x58] sm:$0xff] %v1302_v22  ;;  %v1304_v54 = vmul.f32 0.5, %v1288_v33  ;;  %v1290_v41 = vadd.f32 1.0, %v2046_v46  ;;  %1189 = sbr.rel (!%p1187_p8) target bundleno = 903 (0x387), region = 177 }
 0x3a7   : >> { %1319 = vst [vmem:[%s3025_s11 + $0x60] sm:$0xff] %v1303_v32  ;;  %v1305_v43 = vmul.f32 0.5, %v1289_v56 }
 0x3a8   : >> { %1320 = vst [vmem:[%s3025_s11 + $0x68] sm:$0xff] %v1304_v54  ;;  %v1306_v44 = vmul.f32 0.5, %v1290_v41 }
 0x3a9   : >> { %1321 = vst [vmem:[%s3025_s11 + $0x70] sm:$0xff] %v1305_v43 }
 0x3aa   : >> { %1322 = vst [vmem:[%s3025_s11 + $0x78] sm:$0xff] %v1306_v44 }
 0x3ab LB: >> { %1839 = vmatpush.msra.mxu2 %v3172_v12  ;;  %1840 = vmatpush.msra.mxu3 %v3172_v12  ;;  %s1703_s23 = sshll.u32 %s2135_s22, 7  ;;  %v3270_v20 = vperm.slane %v3177_v13, 0  ;;  %vm1495_vm11 = vcmask 15360   ;;  %s2135_s22 = sphi %s3179_s22, %s1346_s22  }
 0x3ac   : >> { %1366 = vmatpush.msra.mxu0 %v3172_v12  ;;  %1838 = vmatpush.msra.mxu1 %v3172_v12  ;;  %s3245_s24 = scalar_lea.vmem [#allocation2], %s1703_s23  ;;  %s3290_s27 = scalar_lea.vmem %s3337_s4, %s1703_s23 }
 0x3ad   : >> { %1842 = vmatpush.msra.mxu2 %v3167_v4  ;;  %1843 = vmatpush.msra.mxu3 %v3167_v4 }
 0x3ae   : >> { %1367 = vmatpush.msra.mxu0 %v3167_v4  ;;  %1841 = vmatpush.msra.mxu1 %v3167_v4 }
 0x3af   : >> { %1845 = vmatpush.msra.mxu2 %v3162_v9  ;;  %1846 = vmatpush.msra.mxu3 %v3162_v9 }
 0x3b0   : >> { %1368 = vmatpush.msra.mxu0 %v3162_v9  ;;  %1844 = vmatpush.msra.mxu1 %v3162_v9 }
 0x3b1   : >> { %1848 = vmatpush.msra.mxu2 %v3157_v8  ;;  %1849 = vmatpush.msra.mxu3 %v3157_v8  ;;  %v1357_v5 = vld [vmem:[%s3245_s24 + $0x40] sm:$0xff]  ;;  %v1358_v16 = vld [vmem:[%s3245_s24 + $0x48] sm:$0xff]  ;;  %v1359_v42 = vld [vmem:[%s3245_s24 + $0x50] sm:$0xff] }
 0x3b2   : >> { %1369 = vmatpush.msra.mxu0 %v3157_v8  ;;  %1847 = vmatpush.msra.mxu1 %v3157_v8  ;;  %v1361_v14 = vld [vmem:[%s3245_s24 + $0x60] sm:$0xff]  ;;  %v1362_v0 = vld [vmem:[%s3245_s24 + $0x68] sm:$0xff]  ;;  %v1363_v30 = vld [vmem:[%s3245_s24 + $0x70] sm:$0xff] }
 0x3b3   : >> { %1851 = vmatpush.msra.mxu2 %v3152_v6  ;;  %1852 = vmatpush.msra.mxu3 %v3152_v6  ;;  %v1349_v15 = vld [vmem:[%s3245_s24] sm:$0xff]  ;;  %v1350_v17 = vld [vmem:[%s3245_s24 + $0x8] sm:$0xff]  ;;  %v1351_v57 = vld [vmem:[%s3245_s24 + $0x10] sm:$0xff] }
 0x3b4   : >> { %1370 = vmatpush.msra.mxu0 %v3152_v6  ;;  %1850 = vmatpush.msra.mxu1 %v3152_v6  ;;  %v1353_v62 = vld [vmem:[%s3245_s24 + $0x20] sm:$0xff]  ;;  %v1354_v55 = vld [vmem:[%s3245_s24 + $0x28] sm:$0xff]  ;;  %v1355_v50 = vld [vmem:[%s3245_s24 + $0x30] sm:$0xff] }
 0x3b5   : >> { %1854 = vmatpush.msra.mxu2 %v3147_v3  ;;  %1855 = vmatpush.msra.mxu3 %v3147_v3  ;;  %v1360_v18 = vld [vmem:[%s3245_s24 + $0x58] sm:$0xff] }
 0x3b6   : >> { %1371 = vmatpush.msra.mxu0 %v3147_v3  ;;  %1853 = vmatpush.msra.mxu1 %v3147_v3  ;;  %v1364_v59 = vld [vmem:[%s3245_s24 + $0x78] sm:$0xff] }
 0x3b7   : >> { %1857 = vmatpush.msra.mxu2 %v3142_v52  ;;  %1858 = vmatpush.msra.mxu3 %v3142_v52  ;;  %v1352_v38 = vld [vmem:[%s3245_s24 + $0x18] sm:$0xff] }
 0x3b8   : >> { %1372 = vmatpush.msra.mxu0 %v3142_v52  ;;  %1856 = vmatpush.msra.mxu1 %v3142_v52  ;;  %v1356_v19 = vld [vmem:[%s3245_s24 + $0x38] sm:$0xff] }
 0x3b9   : >> { %1860 = vmatpush.msra.mxu2 %v3137_v51  ;;  %1861 = vmatpush.msra.mxu3 %v3137_v51 }
 0x3ba   : >> { %1373 = vmatpush.msra.mxu0 %v3137_v51  ;;  %1859 = vmatpush.msra.mxu1 %v3137_v51 }
 0x3bb   : >> { %1863 = vmatpush.msra.mxu2 %v3132_v2  ;;  %1864 = vmatpush.msra.mxu3 %v3132_v2 }
 0x3bc   : >> { %1374 = vmatpush.msra.mxu0 %v3132_v2  ;;  %1862 = vmatpush.msra.mxu1 %v3132_v2 }
 0x3bd   : >> { %1866 = vmatpush.msra.mxu2 %v3127_v61  ;;  %1867 = vmatpush.msra.mxu3 %v3127_v61 }
 0x3be   : >> { %1375 = vmatpush.msra.mxu0 %v3127_v61  ;;  %1865 = vmatpush.msra.mxu1 %v3127_v61 }
 0x3bf   : >> { %1869 = vmatpush.msra.mxu2 %v3122_v58  ;;  %1870 = vmatpush.msra.mxu3 %v3122_v58 }
 0x3c0   : >> { %1376 = vmatpush.msra.mxu0 %v3122_v58  ;;  %1868 = vmatpush.msra.mxu1 %v3122_v58 }
 0x3c1   : >> { %1872 = vmatpush.msra.mxu2 %v3117_v60  ;;  %1873 = vmatpush.msra.mxu3 %v3117_v60 }
 0x3c2   : >> { %1377 = vmatpush.msra.mxu0 %v3117_v60  ;;  %1871 = vmatpush.msra.mxu1 %v3117_v60 }
 0x3c3   : >> { %1875 = vmatpush.msra.mxu2 %v3112_v49  ;;  %1876 = vmatpush.msra.mxu3 %v3112_v49 }
 0x3c4   : >> { %1378 = vmatpush.msra.mxu0 %v3112_v49  ;;  %1874 = vmatpush.msra.mxu1 %v3112_v49 }
 0x3c5   : >> { %1878 = vmatpush.msra.mxu2 %v3107_v27  ;;  %1879 = vmatpush.msra.mxu3 %v3107_v27 }
 0x3c6   : >> { %1379 = vmatpush.msra.mxu0 %v3107_v27  ;;  %1877 = vmatpush.msra.mxu1 %v3107_v27 }
 0x3c7   : >> { %1881 = vmatpush.msra.mxu2 %v3102_v48  ;;  %1882 = vmatpush.msra.mxu3 %v3102_v48 }
 0x3c8   : >> { %1380 = vmatpush.msra.mxu0 %v3102_v48  ;;  %1880 = vmatpush.msra.mxu1 %v3102_v48 }
 0x3c9   : >> { %1884 = vmatpush.msra.mxu2 %v3097_v37  ;;  %1885 = vmatpush.msra.mxu3 %v3097_v37 }
 0x3ca   : >> { %1406 = vmatmul.f32.vlgmr.msra.gmra.mxu2 %v1357_v5  ;;  %1418 = vmatmul.f32.vlgmr.msra.gmra.mxu3 %v1361_v14 }
 0x3cb   : >> { %1381 = vmatpush.msra.mxu0 %v3097_v37  ;;  %1883 = vmatpush.msra.mxu1 %v3097_v37 }
 0x3cc   : >> { %1382 = vmatmul.f32.vlgmr.msra.gmra.mxu0 %v1349_v15  ;;  %1394 = vmatmul.f32.vlgmr.msra.gmra.mxu1 %v1353_v62 }
 0x3d2   : >> { %1409 = vmatmul.f32.gmra.mxu2 %v1358_v16  ;;  %1421 = vmatmul.f32.gmra.mxu3 %v1362_v0 }
 0x3d4   : >> { %1385 = vmatmul.f32.gmra.mxu0 %v1350_v17  ;;  %1397 = vmatmul.f32.gmra.mxu1 %v1354_v55 }
 0x3da   : >> { %1412 = vmatmul.f32.gmra.mxu2 %v1359_v42  ;;  %1424 = vmatmul.f32.gmra.mxu3 %v1363_v30 }
 0x3dc   : >> { %1388 = vmatmul.f32.gmra.mxu0 %v1351_v57  ;;  %1400 = vmatmul.f32.gmra.mxu1 %v1355_v50 }
 0x3e2   : >> { %1415 = vmatmul.f32.gmra.mxu2 %v1360_v18  ;;  %1427 = vmatmul.f32.gmra.mxu3 %v1364_v59 }
 0x3e4   : >> { %1391 = vmatmul.f32.gmra.mxu0 %v1352_v38  ;;  %1403 = vmatmul.f32.gmra.mxu1 %v1356_v19 }
 0x449   : >> { %v1383_v7 = vpop.f32.mrf.mxu0  ;;  %v1395_v21 = vpop.f32.mrf.mxu1 }
 0x44a   : >> { %v1384_v47 = vadd.f32 %v1383_v7, %v3270_v20  ;;  %v1396_v23 = vadd.f32 %v1395_v21, %v3270_v20 }
 0x44c   : >> { %v1431_v63 = vmul.f32 0.5, %v1384_v47  ;;  %v1435_v10 = vmul.f32 0.5, %v1396_v23 }
 0x44d   : >> { %v1407_v45 = vpop.f32.mrf.mxu2  ;;  %v1419_v24 = vpop.f32.mrf.mxu3 }
 0x44e   : >> { %2047 = vtanh.f32 %v1431_v63  ;;  %v1408_v1 = vadd.f32 %v1407_v45, %v3270_v20  ;;  %v1420_v25 = vadd.f32 %v1419_v24, %v3270_v20 }
 0x44f   : >> { %2049 = vtanh.f32 %v1435_v10 }
 0x450   : >> { %v1439_v28 = vmul.f32 0.5, %v1408_v1  ;;  %v1443_v29 = vmul.f32 0.5, %v1420_v25 }
 0x451   : >> { %v1386_v53 = vpop.f32.mrf.mxu0  ;;  %v1398_v40 = vpop.f32.mrf.mxu1 }
 0x452   : >> { %2051 = vtanh.f32 %v1439_v28  ;;  %v1387_v26 = vadd.f32 %v1386_v53, %v3270_v20  ;;  %v1399_v11 = vadd.f32 %v1398_v40, %v3270_v20 }
 0x453   : >> { %2053 = vtanh.f32 %v1443_v29 }
 0x454   : >> { %v2048_v31 = vpop.eup %2047  ;;  %v1432_v39 = vmul.f32 0.5, %v1387_v26  ;;  %v1436_v34 = vmul.f32 0.5, %v1399_v11 }
 0x455   : >> { %v2050_v36 = vpop.eup %2049  ;;  %v1463_v35 = vadd.f32 1.0, %v2048_v31  ;;  %v1410_v22 = vpop.f32.mrf.mxu2 }
 0x456   : >> { %v1422_v33 = vpop.f32.mrf.mxu3  ;;  %v1467_v46 = vadd.f32 1.0, %v2050_v36  ;;  %2055 = vtanh.f32 %v1432_v39  ;;  %v1411_v32 = vadd.f32 %v1410_v22, %v3270_v20 }
 0x457   : >> { %v1423_v56 = vadd.f32 %v1422_v33, %v3270_v20  ;;  %v1479_v54 = vmul.f32 0.5, %v1463_v35  ;;  %2057 = vtanh.f32 %v1436_v34 }
 0x458   : >> { %v2052_v41 = vpop.eup %2051  ;;  %v1483_v43 = vmul.f32 0.5, %v1467_v46  ;;  %v1440_v44 = vmul.f32 0.5, %v1411_v32 }
 0x459   : >> { %v1444_v5 = vmul.f32 0.5, %v1423_v56  ;;  %v2054_v14 = vpop.eup %2053  ;;  %1496 = vst.msk [vmem:[#allocation5] sm:$0xff] %vm1495_vm11, %v1479_v54  ;;  %v1471_v15 = vadd.f32 1.0, %v2052_v41  ;;  %v1389_v62 = vpop.f32.mrf.mxu0 }
 0x45a   : >> { %v1401_v16 = vpop.f32.mrf.mxu1  ;;  %1500 = vst.msk [vmem:[#allocation5 + $0x20] sm:$0xff] %vm1495_vm11, %v1483_v43  ;;  %v1475_v0 = vadd.f32 1.0, %v2054_v14  ;;  %2059 = vtanh.f32 %v1440_v44  ;;  %v1390_v17 = vadd.f32 %v1389_v62, %v3270_v20 }
 0x45b   : >> { %v1402_v55 = vadd.f32 %v1401_v16, %v3270_v20  ;;  %v1487_v42 = vmul.f32 0.5, %v1471_v15  ;;  %2061 = vtanh.f32 %v1444_v5 }
 0x45c   : >> { %v2056_v30 = vpop.eup %2055  ;;  %v1491_v57 = vmul.f32 0.5, %v1475_v0  ;;  %v1433_v50 = vmul.f32 0.5, %v1390_v17 }
 0x45d   : >> { %v1437_v18 = vmul.f32 0.5, %v1402_v55  ;;  %v2058_v59 = vpop.eup %2057  ;;  %1504 = vst.msk [vmem:[#allocation5 + $0x40] sm:$0xff] %vm1495_vm11, %v1487_v42  ;;  %v1464_v38 = vadd.f32 1.0, %v2056_v30  ;;  %v1413_v19 = vpop.f32.mrf.mxu2 }
 0x45e   : >> { %v1425_v7 = vpop.f32.mrf.mxu3  ;;  %1508 = vst.msk [vmem:[#allocation5 + $0x60] sm:$0xff] %vm1495_vm11, %v1491_v57  ;;  %v1468_v21 = vadd.f32 1.0, %v2058_v59  ;;  %2063 = vtanh.f32 %v1433_v50  ;;  %v1414_v47 = vadd.f32 %v1413_v19, %v3270_v20 }
 0x45f   : >> { %v1426_v23 = vadd.f32 %v1425_v7, %v3270_v20  ;;  %v1480_v63 = vmul.f32 0.5, %v1464_v38  ;;  %2065 = vtanh.f32 %v1437_v18 }
 0x460   : >> { %v2060_v10 = vpop.eup %2059  ;;  %v1523_v45 = vld [vmem:[#allocation5] sm:$0xff]  ;;  %v1484_v24 = vmul.f32 0.5, %v1468_v21  ;;  %v1441_v1 = vmul.f32 0.5, %v1414_v47 }
 0x461   : >> { %v1445_v25 = vmul.f32 0.5, %v1426_v23  ;;  %v2062_v28 = vpop.eup %2061  ;;  %1524 = vst [vmem:[%s3290_s27] sm:$0xff] %v1523_v45  ;;  %v1531_v29 = vld [vmem:[#allocation5 + $0x20] sm:$0xff]  ;;  %v1472_v53 = vadd.f32 1.0, %v2060_v10  ;;  %v1392_v40 = vpop.f32.mrf.mxu0 }
 0x462   : >> { %v1404_v26 = vpop.f32.mrf.mxu1  ;;  %1532 = vst [vmem:[%s3290_s27 + $0x20] sm:$0xff] %v1531_v29  ;;  %v1476_v11 = vadd.f32 1.0, %v2062_v28  ;;  %2067 = vtanh.f32 %v1441_v1  ;;  %v1393_v31 = vadd.f32 %v1392_v40, %v3270_v20 }
 0x463   : >> { %v1405_v39 = vadd.f32 %v1404_v26, %v3270_v20  ;;  %1497 = vst.msk [vmem:[#allocation5 + $0x8] sm:$0xff] %vm1495_vm11, %v1480_v63  ;;  %v1488_v34 = vmul.f32 0.5, %v1472_v53  ;;  %2069 = vtanh.f32 %v1445_v25 }
 0x464   : >> { %v2064_v36 = vpop.eup %2063  ;;  %v1539_v35 = vld [vmem:[#allocation5 + $0x40] sm:$0xff]  ;;  %1501 = vst.msk [vmem:[#allocation5 + $0x28] sm:$0xff] %vm1495_vm11, %v1484_v24  ;;  %v1492_v22 = vmul.f32 0.5, %v1476_v11  ;;  %v1434_v33 = vmul.f32 0.5, %v1393_v31 }
 0x465   : >> { %v1438_v46 = vmul.f32 0.5, %v1405_v39  ;;  %v2066_v32 = vpop.eup %2065  ;;  %1540 = vst [vmem:[%s3290_s27 + $0x40] sm:$0xff] %v1539_v35  ;;  %v1547_v56 = vld [vmem:[#allocation5 + $0x60] sm:$0xff]  ;;  %v1465_v54 = vadd.f32 1.0, %v2064_v36  ;;  %v1416_v41 = vpop.f32.mrf.mxu2 }
 0x466   : >> { %v1428_v43 = vpop.f32.mrf.mxu3  ;;  %1548 = vst [vmem:[%s3290_s27 + $0x60] sm:$0xff] %v1547_v56  ;;  %v1469_v44 = vadd.f32 1.0, %v2066_v32  ;;  %2071 = vtanh.f32 %v1434_v33  ;;  %v1417_v5 = vadd.f32 %v1416_v41, %v3270_v20 }
 0x467   : >> { %v1429_v14 = vadd.f32 %v1428_v43, %v3270_v20  ;;  %1505 = vst.msk [vmem:[#allocation5 + $0x48] sm:$0xff] %vm1495_vm11, %v1488_v34  ;;  %v1481_v15 = vmul.f32 0.5, %v1465_v54  ;;  %2073 = vtanh.f32 %v1438_v46 }
 0x468   : >> { %v2068_v62 = vpop.eup %2067  ;;  %1509 = vst.msk [vmem:[#allocation5 + $0x68] sm:$0xff] %vm1495_vm11, %v1492_v22  ;;  %v1485_v16 = vmul.f32 0.5, %v1469_v44  ;;  %v1442_v0 = vmul.f32 0.5, %v1417_v5 }
 0x469   : >> { %v1446_v17 = vmul.f32 0.5, %v1429_v14  ;;  %v2070_v55 = vpop.eup %2069  ;;  %1498 = vst.msk [vmem:[#allocation5 + $0x10] sm:$0xff] %vm1495_vm11, %v1481_v15  ;;  %v1473_v42 = vadd.f32 1.0, %v2068_v62 }
 0x46a   : >> { %v1525_v30 = vld [vmem:[#allocation5 + $0x8] sm:$0xff]  ;;  %1502 = vst.msk [vmem:[#allocation5 + $0x30] sm:$0xff] %vm1495_vm11, %v1485_v16  ;;  %v1477_v20 = vadd.f32 1.0, %v2070_v55  ;;  %2075 = vtanh.f32 %v1442_v0 }
 0x46b   : >> { %1526 = vst [vmem:[%s3290_s27 + $0x8] sm:$0xff] %v1525_v30  ;;  %v1533_v57 = vld [vmem:[#allocation5 + $0x28] sm:$0xff]  ;;  %v1489_v50 = vmul.f32 0.5, %v1473_v42  ;;  %2077 = vtanh.f32 %v1446_v17 }
 0x46c   : >> { %v2072_v18 = vpop.eup %2071  ;;  %1534 = vst [vmem:[%s3290_s27 + $0x28] sm:$0xff] %v1533_v57  ;;  %v1493_v59 = vmul.f32 0.5, %v1477_v20 }
 0x46d   : >> { %v2074_v38 = vpop.eup %2073  ;;  %1506 = vst.msk [vmem:[#allocation5 + $0x50] sm:$0xff] %vm1495_vm11, %v1489_v50  ;;  %v1466_v19 = vadd.f32 1.0, %v2072_v18 }
 0x46e   : >> { %v1541_v7 = vld [vmem:[#allocation5 + $0x48] sm:$0xff]  ;;  %1510 = vst.msk [vmem:[#allocation5 + $0x70] sm:$0xff] %vm1495_vm11, %v1493_v59  ;;  %v1470_v21 = vadd.f32 1.0, %v2074_v38 }
 0x46f   : >> { %1542 = vst [vmem:[%s3290_s27 + $0x48] sm:$0xff] %v1541_v7  ;;  %v1549_v47 = vld [vmem:[#allocation5 + $0x68] sm:$0xff]  ;;  %v1482_v23 = vmul.f32 0.5, %v1466_v19 }
 0x470   : >> { %v2076_v63 = vpop.eup %2075  ;;  %1550 = vst [vmem:[%s3290_s27 + $0x68] sm:$0xff] %v1549_v47  ;;  %v1527_v10 = vld [vmem:[#allocation5 + $0x10] sm:$0xff]  ;;  %v1486_v45 = vmul.f32 0.5, %v1470_v21 }
 0x471   : >> { %v2078_v24 = vpop.eup %2077  ;;  %1528 = vst [vmem:[%s3290_s27 + $0x10] sm:$0xff] %v1527_v10  ;;  %v1535_v1 = vld [vmem:[#allocation5 + $0x30] sm:$0xff]  ;;  %v1474_v25 = vadd.f32 1.0, %v2076_v63 }
 0x472   : >> { %1536 = vst [vmem:[%s3290_s27 + $0x30] sm:$0xff] %v1535_v1  ;;  %v1478_v28 = vadd.f32 1.0, %v2078_v24 }
 0x473   : >> { %1499 = vst.msk [vmem:[#allocation5 + $0x18] sm:$0xff] %vm1495_vm11, %v1482_v23  ;;  %v1490_v29 = vmul.f32 0.5, %v1474_v25 }
 0x474   : >> { %v1543_v53 = vld [vmem:[#allocation5 + $0x50] sm:$0xff]  ;;  %1503 = vst.msk [vmem:[#allocation5 + $0x38] sm:$0xff] %vm1495_vm11, %v1486_v45  ;;  %v1494_v40 = vmul.f32 0.5, %v1478_v28 }
 0x475   : >> { %1544 = vst [vmem:[%s3290_s27 + $0x50] sm:$0xff] %v1543_v53  ;;  %v1551_v26 = vld [vmem:[#allocation5 + $0x70] sm:$0xff] }
 0x476   : >> { %1552 = vst [vmem:[%s3290_s27 + $0x70] sm:$0xff] %v1551_v26 }
 0x477   : >> { %1507 = vst.msk [vmem:[#allocation5 + $0x58] sm:$0xff] %vm1495_vm11, %v1490_v29 }
 0x478   : >> { %1511 = vst.msk [vmem:[#allocation5 + $0x78] sm:$0xff] %vm1495_vm11, %v1494_v40 }
 0x47a   : >> { %v1529_v11 = vld [vmem:[#allocation5 + $0x18] sm:$0xff] }
 0x47b   : >> { %1530 = vst [vmem:[%s3290_s27 + $0x18] sm:$0xff] %v1529_v11  ;;  %v1537_v31 = vld [vmem:[#allocation5 + $0x38] sm:$0xff] }
 0x47c   : >> { %1538 = vst [vmem:[%s3290_s27 + $0x38] sm:$0xff] %v1537_v31 }
 0x47e   : >> { %v1545_v39 = vld [vmem:[#allocation5 + $0x58] sm:$0xff] }
 0x47f   : >> { %1546 = vst [vmem:[%s3290_s27 + $0x58] sm:$0xff] %v1545_v39  ;;  %v1553_v34 = vld [vmem:[#allocation5 + $0x78] sm:$0xff] }
 0x480   : >> { %1554 = vst [vmem:[%s3290_s27 + $0x78] sm:$0xff] %v1553_v34 }
 0x481   : >> { %1560 = vsyncadd [#allocation6], 2048 }
 0x482   : >> { %2107 = dma.done.wait [#allocation6], 2048 }
 0x483   : >> { %2108 = vsyncadd [#allocation6], 4294965248  ;;  %s1346_s22 = sadd.s32 1, %s2135_s22  }
 0x484   : >> { %p1343_p9 = scmp.ge.s32.totalorder %s1346_s22, 2  }
 0x486   : > { %1345 = sbr.rel (!%p1343_p9) target bundleno = 939 (0x3ab), region = 188 }
 0x48b PF: > { %s14_s15 = sadd.s32 1, %s2111_s15  }
 0x48c   : > { %p11_p10 = scmp.ge.s32.totalorder %s14_s15, 3  }
 0x48e   :  { %13 = sbr.rel (!%p11_p10) target bundleno = 1 (0x1), region = 199 }
 0x493   :  { %1564 = vsyncmov [#allocation6] }
 0x496   :  { %s1565_s28 = vpop.sfrf %1564 }
 0x497   :  { %p1704_p11 = scmp.ne.s32.totalorder %s1565_s28, 0 }
 0x499   :  { %1569 = shalt.err (%p1704_p11)  }

</bundles_post_ra>
